<compile_context>
chip_gen: v6e
topology: v6e:2x2x1
jax: 0.10.0
libtpu: 0.0.40
codegen_flags: <defaults>
</compile_context>

<pallas_src>
import jax
import jax.numpy as jnp
from jax.experimental import pallas as pl
from jax.experimental.pallas import tpu as pltpu

# ---------------------------------------------------------------------------
# Static layer topology (matches nn.Linear(2,5) -> 3x nn.Linear(5,5) -> nn.Linear(5,1)).
# ---------------------------------------------------------------------------
_DIMS = ((2, 5), (5, 5), (5, 5), (5, 5), (5, 1))


def _theta_layout():
    """Offsets of each layer's (W, b) inside the flat parameter vector."""
    offs, pos = [], 0
    for fan_in, fan_out in _DIMS:
        offs.append((pos, pos + fan_in * fan_out))      # (w_offset, b_offset)
        pos += fan_in * fan_out + fan_out
    return tuple(offs), pos


_OFFS, _THETA_SIZE = _theta_layout()                    # 111 floats total


# ---------------------------------------------------------------------------
# Kernel
# ---------------------------------------------------------------------------
def _mlp_kernel(theta_ref, x_ref, t_ref, out_ref):
    """theta_ref: (THETA,) f32 in SMEM; x/t/out refs: (1, TILE) f32 in VMEM."""

    def dense(rows, layer, activate):
        w_off, b_off = _OFFS[layer]
        fan_in, fan_out = _DIMS[layer]
        outs = []
        for j in range(fan_out):
            # out_j = b_j + sum_k W[k, j] * row_k  -- scalar * (1, TILE) FMAs (VPU),
            # weight scalars come from SMEM (sreg -> lane splat, no MXU involved).
            s = theta_ref[b_off + j] + theta_ref[w_off + j] * rows[0]
            for k in range(1, fan_in):
                s = s + theta_ref[w_off + k * fan_out + j] * rows[k]
            outs.append(jax.nn.sigmoid(s) if activate else s)   # exp on EUP
        return outs

    # "torch.cat([x, t], axis=1)" == simply using both lane-dense rows.
    h = [x_ref[...], t_ref[...]]
    for layer in range(4):
        h = dense(h, layer, activate=True)
    out_ref[...] = dense(h, 4, activate=False)[0]


# ---------------------------------------------------------------------------
# Wrapper
# ---------------------------------------------------------------------------
def pack_params(params):
    pieces = []
    for i in range(1, 6):
        pieces.append(params[f"w{i}"].reshape(-1))      # (fan_in, fan_out) row-major
        pieces.append(params[f"b{i}"].reshape(-1))
    theta = jnp.concatenate(pieces).astype(jnp.float32)
    assert theta.shape[0] == _THETA_SIZE
    return theta


def _pick_tile(n_pad, requested):
    tile = min(requested, n_pad)                        # both multiples of 128
    while n_pad % tile != 0:
        tile -= 128
    return tile


def net_forward(x, t, params, *, tile_n=2048):
    """x: (N, 1) f32, t: (N, 1) f32 -> (N, 1) f32 (matches Net.forward)."""
    n = x.shape[0]
    theta = pack_params(params)

    # Lane-dense layout: batch lives on the 128-wide lane axis.
    xr = x.astype(jnp.float32).reshape(1, n)
    tr = t.astype(jnp.float32).reshape(1, n)

    n_pad = max(128, -(-n // 128) * 128)
    tile = _pick_tile(n_pad, max(128, tile_n))
    if n_pad != n:
        xr = jnp.pad(xr, ((0, 0), (0, n_pad - n)))
        tr = jnp.pad(tr, ((0, 0), (0, n_pad - n)))

    row_spec = pl.BlockSpec((1, tile), lambda i: (0, i))

    out_row = pl.pallas_call(
        _mlp_kernel,
        out_shape=jax.ShapeDtypeStruct((1, n_pad), jnp.float32),
        grid=(n_pad // tile,),
        in_specs=[
            pl.BlockSpec(memory_space=pltpu.MemorySpace.SMEM),   # flat params
            row_spec,                                            # x row
            row_spec,                                            # t row
        ],
        out_specs=row_spec,
        compiler_params=pltpu.CompilerParams(
            dimension_semantics=("parallel",),    # megacore split on v7x
            vmem_limit_bytes=32 * 1024 * 1024,    # tiles are tiny; safe on all gens
        ),
        cost_estimate=pl.CostEstimate(
            flops=200 * n_pad,                    # ~180 FMAs + 16 bias adds / column
            transcendentals=20 * n_pad,           # 20 sigmoids (exp) / column
            bytes_accessed=3 * 4 * n_pad + 4 * _THETA_SIZE,
        ),
    )(theta, xr, tr)

    return out_row[:, :n].reshape(n, 1)


# ---------------------------------------------------------------------------
# Params init (mimics nn.Linear: uniform +-1/sqrt(fan_in)) and pure-JAX reference
# ---------------------------------------------------------------------------
def init_params(key):
    params = {}
    for i, (fan_in, fan_out) in enumerate(_DIMS, start=1):
        key, kw, kb = jax.random.split(key, 3)
        bound = 1.0 / float(fan_in) ** 0.5
        params[f"w{i}"] = jax.random.uniform(
            kw, (fan_in, fan_out), jnp.float32, -bound, bound)
        params[f"b{i}"] = jax.random.uniform(
            kb, (fan_out,), jnp.float32, -bound, bound)
    return params


def reference_forward(x, t, params):
    """Pure-JAX mirror of the PyTorch forward."""
    h = jnp.concatenate([x.astype(jnp.float32), t.astype(jnp.float32)], axis=1)
    for i in range(1, 5):
        h = jax.nn.sigmoid(h @ params[f"w{i}"] + params[f"b{i}"])
    return h @ params["w5"] + params["b5"]


if __name__ == "__main__":
    key = jax.random.PRNGKey(0)
    kp, kx, kt = jax.random.split(key, 3)

    params = init_params(kp)
    N = 1000                                   # exercises padding + a 4-step grid
    x = jax.random.normal(kx, (N, 1), jnp.float32)
    t = jax.random.normal(kt, (N, 1), jnp.float32)

    out = net_forward(x, t, params, tile_n=256)
    out = jax.block_until_ready(out)

    ref = reference_forward(x, t, params)
    assert out.shape == (N, 1)
    assert jnp.allclose(out, ref, atol=1e-5, rtol=1e-4), "mismatch vs reference"

    print("KERNEL_OK")
</pallas_src>

<mosaic_0001>
module attributes {stable_mosaic.version = 11 : i64} {
  func.func @_mlp_kernel(%arg0: i32, %arg1: memref<111xf32, #tpu.memory_space<smem>>, %arg2: memref<1x256xf32, #tpu.memory_space<vmem>>, %arg3: memref<1x256xf32, #tpu.memory_space<vmem>>, %arg4: memref<1x256xf32, #tpu.memory_space<vmem>>) attributes {dimension_semantics = [#tpu.dimension_semantics<parallel>], iteration_bounds = array<i64: 4>, scalar_prefetch = 0 : i64, scratch_operands = 0 : i64, tpu.core_type = #tpu.core_type<tc>, window_params = [{transform_indices = @transform_0, window_bounds = array<i64: 111>}, {transform_indices = @transform_1, window_bounds = array<i64: 1, 256>}, {transform_indices = @transform_2, window_bounds = array<i64: 1, 256>}, {transform_indices = @transform_3, window_bounds = array<i64: 1, 256>}]} {
    %c0 = arith.constant 0 : index
    %c0_0 = arith.constant 0 : index
    %0 = vector.load %arg2[%c0, %c0_0] : memref<1x256xf32, #tpu.memory_space<vmem>>, vector<1x256xf32>
    %c0_1 = arith.constant 0 : index
    %c0_2 = arith.constant 0 : index
    %1 = vector.load %arg3[%c0_1, %c0_2] : memref<1x256xf32, #tpu.memory_space<vmem>>, vector<1x256xf32>
    %c10 = arith.constant 10 : index
    %2 = memref.load %arg1[%c10] : memref<111xf32, #tpu.memory_space<smem>>
    %c0_3 = arith.constant 0 : index
    %3 = memref.load %arg1[%c0_3] : memref<111xf32, #tpu.memory_space<smem>>
    %4 = vector.broadcast %3 : f32 to vector<1x256xf32>
    %5 = arith.mulf %4, %0 : vector<1x256xf32>
    %6 = vector.broadcast %2 : f32 to vector<1x256xf32>
    %7 = arith.addf %6, %5 : vector<1x256xf32>
    %c5 = arith.constant 5 : index
    %8 = memref.load %arg1[%c5] : memref<111xf32, #tpu.memory_space<smem>>
    %9 = vector.broadcast %8 : f32 to vector<1x256xf32>
    %10 = arith.mulf %9, %1 : vector<1x256xf32>
    %11 = arith.addf %7, %10 : vector<1x256xf32>
    %12 = arith.negf %11 : vector<1x256xf32>
    %13 = math.exp %12 : vector<1x256xf32>
    %cst = arith.constant 1.000000e+00 : f32
    %14 = vector.broadcast %cst : f32 to vector<1x256xf32>
    %15 = arith.addf %14, %13 : vector<1x256xf32>
    %16 = arith.divf %14, %15 : vector<1x256xf32>
    %c11 = arith.constant 11 : index
    %17 = memref.load %arg1[%c11] : memref<111xf32, #tpu.memory_space<smem>>
    %c1 = arith.constant 1 : index
    %18 = memref.load %arg1[%c1] : memref<111xf32, #tpu.memory_space<smem>>
    %19 = vector.broadcast %18 : f32 to vector<1x256xf32>
    %20 = arith.mulf %19, %0 : vector<1x256xf32>
    %21 = vector.broadcast %17 : f32 to vector<1x256xf32>
    %22 = arith.addf %21, %20 : vector<1x256xf32>
    %c6 = arith.constant 6 : index
    %23 = memref.load %arg1[%c6] : memref<111xf32, #tpu.memory_space<smem>>
    %24 = vector.broadcast %23 : f32 to vector<1x256xf32>
    %25 = arith.mulf %24, %1 : vector<1x256xf32>
    %26 = arith.addf %22, %25 : vector<1x256xf32>
    %27 = arith.negf %26 : vector<1x256xf32>
    %28 = math.exp %27 : vector<1x256xf32>
    %cst_4 = arith.constant 1.000000e+00 : f32
    %29 = vector.broadcast %cst_4 : f32 to vector<1x256xf32>
    %30 = arith.addf %29, %28 : vector<1x256xf32>
    %31 = arith.divf %29, %30 : vector<1x256xf32>
    %c12 = arith.constant 12 : index
    %32 = memref.load %arg1[%c12] : memref<111xf32, #tpu.memory_space<smem>>
    %c2 = arith.constant 2 : index
    %33 = memref.load %arg1[%c2] : memref<111xf32, #tpu.memory_space<smem>>
    %34 = vector.broadcast %33 : f32 to vector<1x256xf32>
    %35 = arith.mulf %34, %0 : vector<1x256xf32>
    %36 = vector.broadcast %32 : f32 to vector<1x256xf32>
    %37 = arith.addf %36, %35 : vector<1x256xf32>
    %c7 = arith.constant 7 : index
    %38 = memref.load %arg1[%c7] : memref<111xf32, #tpu.memory_space<smem>>
    %39 = vector.broadcast %38 : f32 to vector<1x256xf32>
    %40 = arith.mulf %39, %1 : vector<1x256xf32>
    %41 = arith.addf %37, %40 : vector<1x256xf32>
    %42 = arith.negf %41 : vector<1x256xf32>
    %43 = math.exp %42 : vector<1x256xf32>
    %cst_5 = arith.constant 1.000000e+00 : f32
    %44 = vector.broadcast %cst_5 : f32 to vector<1x256xf32>
    %45 = arith.addf %44, %43 : vector<1x256xf32>
    %46 = arith.divf %44, %45 : vector<1x256xf32>
    %c13 = arith.constant 13 : index
    %47 = memref.load %arg1[%c13] : memref<111xf32, #tpu.memory_space<smem>>
    %c3 = arith.constant 3 : index
    %48 = memref.load %arg1[%c3] : memref<111xf32, #tpu.memory_space<smem>>
    %49 = vector.broadcast %48 : f32 to vector<1x256xf32>
    %50 = arith.mulf %49, %0 : vector<1x256xf32>
    %51 = vector.broadcast %47 : f32 to vector<1x256xf32>
    %52 = arith.addf %51, %50 : vector<1x256xf32>
    %c8 = arith.constant 8 : index
    %53 = memref.load %arg1[%c8] : memref<111xf32, #tpu.memory_space<smem>>
    %54 = vector.broadcast %53 : f32 to vector<1x256xf32>
    %55 = arith.mulf %54, %1 : vector<1x256xf32>
    %56 = arith.addf %52, %55 : vector<1x256xf32>
    %57 = arith.negf %56 : vector<1x256xf32>
    %58 = math.exp %57 : vector<1x256xf32>
    %cst_6 = arith.constant 1.000000e+00 : f32
    %59 = vector.broadcast %cst_6 : f32 to vector<1x256xf32>
    %60 = arith.addf %59, %58 : vector<1x256xf32>
    %61 = arith.divf %59, %60 : vector<1x256xf32>
    %c14 = arith.constant 14 : index
    %62 = memref.load %arg1[%c14] : memref<111xf32, #tpu.memory_space<smem>>
    %c4 = arith.constant 4 : index
    %63 = memref.load %arg1[%c4] : memref<111xf32, #tpu.memory_space<smem>>
    %64 = vector.broadcast %63 : f32 to vector<1x256xf32>
    %65 = arith.mulf %64, %0 : vector<1x256xf32>
    %66 = vector.broadcast %62 : f32 to vector<1x256xf32>
    %67 = arith.addf %66, %65 : vector<1x256xf32>
    %c9 = arith.constant 9 : index
    %68 = memref.load %arg1[%c9] : memref<111xf32, #tpu.memory_space<smem>>
    %69 = vector.broadcast %68 : f32 to vector<1x256xf32>
    %70 = arith.mulf %69, %1 : vector<1x256xf32>
    %71 = arith.addf %67, %70 : vector<1x256xf32>
    %72 = arith.negf %71 : vector<1x256xf32>
    %73 = math.exp %72 : vector<1x256xf32>
    %cst_7 = arith.constant 1.000000e+00 : f32
    %74 = vector.broadcast %cst_7 : f32 to vector<1x256xf32>
    %75 = arith.addf %74, %73 : vector<1x256xf32>
    %76 = arith.divf %74, %75 : vector<1x256xf32>
    %c40 = arith.constant 40 : index
    %77 = memref.load %arg1[%c40] : memref<111xf32, #tpu.memory_space<smem>>
    %c15 = arith.constant 15 : index
    %78 = memref.load %arg1[%c15] : memref<111xf32, #tpu.memory_space<smem>>
    %79 = vector.broadcast %78 : f32 to vector<1x256xf32>
    %80 = arith.mulf %79, %16 : vector<1x256xf32>
    %81 = vector.broadcast %77 : f32 to vector<1x256xf32>
    %82 = arith.addf %81, %80 : vector<1x256xf32>
    %c20 = arith.constant 20 : index
    %83 = memref.load %arg1[%c20] : memref<111xf32, #tpu.memory_space<smem>>
    %84 = vector.broadcast %83 : f32 to vector<1x256xf32>
    %85 = arith.mulf %84, %31 : vector<1x256xf32>
    %86 = arith.addf %82, %85 : vector<1x256xf32>
    %c25 = arith.constant 25 : index
    %87 = memref.load %arg1[%c25] : memref<111xf32, #tpu.memory_space<smem>>
    %88 = vector.broadcast %87 : f32 to vector<1x256xf32>
    %89 = arith.mulf %88, %46 : vector<1x256xf32>
    %90 = arith.addf %86, %89 : vector<1x256xf32>
    %c30 = arith.constant 30 : index
    %91 = memref.load %arg1[%c30] : memref<111xf32, #tpu.memory_space<smem>>
    %92 = vector.broadcast %91 : f32 to vector<1x256xf32>
    %93 = arith.mulf %92, %61 : vector<1x256xf32>
    %94 = arith.addf %90, %93 : vector<1x256xf32>
    %c35 = arith.constant 35 : index
    %95 = memref.load %arg1[%c35] : memref<111xf32, #tpu.memory_space<smem>>
    %96 = vector.broadcast %95 : f32 to vector<1x256xf32>
    %97 = arith.mulf %96, %76 : vector<1x256xf32>
    %98 = arith.addf %94, %97 : vector<1x256xf32>
    %99 = arith.negf %98 : vector<1x256xf32>
    %100 = math.exp %99 : vector<1x256xf32>
    %cst_8 = arith.constant 1.000000e+00 : f32
    %101 = vector.broadcast %cst_8 : f32 to vector<1x256xf32>
    %102 = arith.addf %101, %100 : vector<1x256xf32>
    %103 = arith.divf %101, %102 : vector<1x256xf32>
    %c41 = arith.constant 41 : index
    %104 = memref.load %arg1[%c41] : memref<111xf32, #tpu.memory_space<smem>>
    %c16 = arith.constant 16 : index
    %105 = memref.load %arg1[%c16] : memref<111xf32, #tpu.memory_space<smem>>
    %106 = vector.broadcast %105 : f32 to vector<1x256xf32>
    %107 = arith.mulf %106, %16 : vector<1x256xf32>
    %108 = vector.broadcast %104 : f32 to vector<1x256xf32>
    %109 = arith.addf %108, %107 : vector<1x256xf32>
    %c21 = arith.constant 21 : index
    %110 = memref.load %arg1[%c21] : memref<111xf32, #tpu.memory_space<smem>>
    %111 = vector.broadcast %110 : f32 to vector<1x256xf32>
    %112 = arith.mulf %111, %31 : vector<1x256xf32>
    %113 = arith.addf %109, %112 : vector<1x256xf32>
    %c26 = arith.constant 26 : index
    %114 = memref.load %arg1[%c26] : memref<111xf32, #tpu.memory_space<smem>>
    %115 = vector.broadcast %114 : f32 to vector<1x256xf32>
    %116 = arith.mulf %115, %46 : vector<1x256xf32>
    %117 = arith.addf %113, %116 : vector<1x256xf32>
    %c31 = arith.constant 31 : index
    %118 = memref.load %arg1[%c31] : memref<111xf32, #tpu.memory_space<smem>>
    %119 = vector.broadcast %118 : f32 to vector<1x256xf32>
    %120 = arith.mulf %119, %61 : vector<1x256xf32>
    %121 = arith.addf %117, %120 : vector<1x256xf32>
    %c36 = arith.constant 36 : index
    %122 = memref.load %arg1[%c36] : memref<111xf32, #tpu.memory_space<smem>>
    %123 = vector.broadcast %122 : f32 to vector<1x256xf32>
    %124 = arith.mulf %123, %76 : vector<1x256xf32>
    %125 = arith.addf %121, %124 : vector<1x256xf32>
    %126 = arith.negf %125 : vector<1x256xf32>
    %127 = math.exp %126 : vector<1x256xf32>
    %cst_9 = arith.constant 1.000000e+00 : f32
    %128 = vector.broadcast %cst_9 : f32 to vector<1x256xf32>
    %129 = arith.addf %128, %127 : vector<1x256xf32>
    %130 = arith.divf %128, %129 : vector<1x256xf32>
    %c42 = arith.constant 42 : index
    %131 = memref.load %arg1[%c42] : memref<111xf32, #tpu.memory_space<smem>>
    %c17 = arith.constant 17 : index
    %132 = memref.load %arg1[%c17] : memref<111xf32, #tpu.memory_space<smem>>
    %133 = vector.broadcast %132 : f32 to vector<1x256xf32>
    %134 = arith.mulf %133, %16 : vector<1x256xf32>
    %135 = vector.broadcast %131 : f32 to vector<1x256xf32>
    %136 = arith.addf %135, %134 : vector<1x256xf32>
    %c22 = arith.constant 22 : index
    %137 = memref.load %arg1[%c22] : memref<111xf32, #tpu.memory_space<smem>>
    %138 = vector.broadcast %137 : f32 to vector<1x256xf32>
    %139 = arith.mulf %138, %31 : vector<1x256xf32>
    %140 = arith.addf %136, %139 : vector<1x256xf32>
    %c27 = arith.constant 27 : index
    %141 = memref.load %arg1[%c27] : memref<111xf32, #tpu.memory_space<smem>>
    %142 = vector.broadcast %141 : f32 to vector<1x256xf32>
    %143 = arith.mulf %142, %46 : vector<1x256xf32>
    %144 = arith.addf %140, %143 : vector<1x256xf32>
    %c32 = arith.constant 32 : index
    %145 = memref.load %arg1[%c32] : memref<111xf32, #tpu.memory_space<smem>>
    %146 = vector.broadcast %145 : f32 to vector<1x256xf32>
    %147 = arith.mulf %146, %61 : vector<1x256xf32>
    %148 = arith.addf %144, %147 : vector<1x256xf32>
    %c37 = arith.constant 37 : index
    %149 = memref.load %arg1[%c37] : memref<111xf32, #tpu.memory_space<smem>>
    %150 = vector.broadcast %149 : f32 to vector<1x256xf32>
    %151 = arith.mulf %150, %76 : vector<1x256xf32>
    %152 = arith.addf %148, %151 : vector<1x256xf32>
    %153 = arith.negf %152 : vector<1x256xf32>
    %154 = math.exp %153 : vector<1x256xf32>
    %cst_10 = arith.constant 1.000000e+00 : f32
    %155 = vector.broadcast %cst_10 : f32 to vector<1x256xf32>
    %156 = arith.addf %155, %154 : vector<1x256xf32>
    %157 = arith.divf %155, %156 : vector<1x256xf32>
    %c43 = arith.constant 43 : index
    %158 = memref.load %arg1[%c43] : memref<111xf32, #tpu.memory_space<smem>>
    %c18 = arith.constant 18 : index
    %159 = memref.load %arg1[%c18] : memref<111xf32, #tpu.memory_space<smem>>
    %160 = vector.broadcast %159 : f32 to vector<1x256xf32>
    %161 = arith.mulf %160, %16 : vector<1x256xf32>
    %162 = vector.broadcast %158 : f32 to vector<1x256xf32>
    %163 = arith.addf %162, %161 : vector<1x256xf32>
    %c23 = arith.constant 23 : index
    %164 = memref.load %arg1[%c23] : memref<111xf32, #tpu.memory_space<smem>>
    %165 = vector.broadcast %164 : f32 to vector<1x256xf32>
    %166 = arith.mulf %165, %31 : vector<1x256xf32>
    %167 = arith.addf %163, %166 : vector<1x256xf32>
    %c28 = arith.constant 28 : index
    %168 = memref.load %arg1[%c28] : memref<111xf32, #tpu.memory_space<smem>>
    %169 = vector.broadcast %168 : f32 to vector<1x256xf32>
    %170 = arith.mulf %169, %46 : vector<1x256xf32>
    %171 = arith.addf %167, %170 : vector<1x256xf32>
    %c33 = arith.constant 33 : index
    %172 = memref.load %arg1[%c33] : memref<111xf32, #tpu.memory_space<smem>>
    %173 = vector.broadcast %172 : f32 to vector<1x256xf32>
    %174 = arith.mulf %173, %61 : vector<1x256xf32>
    %175 = arith.addf %171, %174 : vector<1x256xf32>
    %c38 = arith.constant 38 : index
    %176 = memref.load %arg1[%c38] : memref<111xf32, #tpu.memory_space<smem>>
    %177 = vector.broadcast %176 : f32 to vector<1x256xf32>
    %178 = arith.mulf %177, %76 : vector<1x256xf32>
    %179 = arith.addf %175, %178 : vector<1x256xf32>
    %180 = arith.negf %179 : vector<1x256xf32>
    %181 = math.exp %180 : vector<1x256xf32>
    %cst_11 = arith.constant 1.000000e+00 : f32
    %182 = vector.broadcast %cst_11 : f32 to vector<1x256xf32>
    %183 = arith.addf %182, %181 : vector<1x256xf32>
    %184 = arith.divf %182, %183 : vector<1x256xf32>
    %c44 = arith.constant 44 : index
    %185 = memref.load %arg1[%c44] : memref<111xf32, #tpu.memory_space<smem>>
    %c19 = arith.constant 19 : index
    %186 = memref.load %arg1[%c19] : memref<111xf32, #tpu.memory_space<smem>>
    %187 = vector.broadcast %186 : f32 to vector<1x256xf32>
    %188 = arith.mulf %187, %16 : vector<1x256xf32>
    %189 = vector.broadcast %185 : f32 to vector<1x256xf32>
    %190 = arith.addf %189, %188 : vector<1x256xf32>
    %c24 = arith.constant 24 : index
    %191 = memref.load %arg1[%c24] : memref<111xf32, #tpu.memory_space<smem>>
    %192 = vector.broadcast %191 : f32 to vector<1x256xf32>
    %193 = arith.mulf %192, %31 : vector<1x256xf32>
    %194 = arith.addf %190, %193 : vector<1x256xf32>
    %c29 = arith.constant 29 : index
    %195 = memref.load %arg1[%c29] : memref<111xf32, #tpu.memory_space<smem>>
    %196 = vector.broadcast %195 : f32 to vector<1x256xf32>
    %197 = arith.mulf %196, %46 : vector<1x256xf32>
    %198 = arith.addf %194, %197 : vector<1x256xf32>
    %c34 = arith.constant 34 : index
    %199 = memref.load %arg1[%c34] : memref<111xf32, #tpu.memory_space<smem>>
    %200 = vector.broadcast %199 : f32 to vector<1x256xf32>
    %201 = arith.mulf %200, %61 : vector<1x256xf32>
    %202 = arith.addf %198, %201 : vector<1x256xf32>
    %c39 = arith.constant 39 : index
    %203 = memref.load %arg1[%c39] : memref<111xf32, #tpu.memory_space<smem>>
    %204 = vector.broadcast %203 : f32 to vector<1x256xf32>
    %205 = arith.mulf %204, %76 : vector<1x256xf32>
    %206 = arith.addf %202, %205 : vector<1x256xf32>
    %207 = arith.negf %206 : vector<1x256xf32>
    %208 = math.exp %207 : vector<1x256xf32>
    %cst_12 = arith.constant 1.000000e+00 : f32
    %209 = vector.broadcast %cst_12 : f32 to vector<1x256xf32>
    %210 = arith.addf %209, %208 : vector<1x256xf32>
    %211 = arith.divf %209, %210 : vector<1x256xf32>
    %c70 = arith.constant 70 : index
    %212 = memref.load %arg1[%c70] : memref<111xf32, #tpu.memory_space<smem>>
    %c45 = arith.constant 45 : index
    %213 = memref.load %arg1[%c45] : memref<111xf32, #tpu.memory_space<smem>>
    %214 = vector.broadcast %213 : f32 to vector<1x256xf32>
    %215 = arith.mulf %214, %103 : vector<1x256xf32>
    %216 = vector.broadcast %212 : f32 to vector<1x256xf32>
    %217 = arith.addf %216, %215 : vector<1x256xf32>
    %c50 = arith.constant 50 : index
    %218 = memref.load %arg1[%c50] : memref<111xf32, #tpu.memory_space<smem>>
    %219 = vector.broadcast %218 : f32 to vector<1x256xf32>
    %220 = arith.mulf %219, %130 : vector<1x256xf32>
    %221 = arith.addf %217, %220 : vector<1x256xf32>
    %c55 = arith.constant 55 : index
    %222 = memref.load %arg1[%c55] : memref<111xf32, #tpu.memory_space<smem>>
    %223 = vector.broadcast %222 : f32 to vector<1x256xf32>
    %224 = arith.mulf %223, %157 : vector<1x256xf32>
    %225 = arith.addf %221, %224 : vector<1x256xf32>
    %c60 = arith.constant 60 : index
    %226 = memref.load %arg1[%c60] : memref<111xf32, #tpu.memory_space<smem>>
    %227 = vector.broadcast %226 : f32 to vector<1x256xf32>
    %228 = arith.mulf %227, %184 : vector<1x256xf32>
    %229 = arith.addf %225, %228 : vector<1x256xf32>
    %c65 = arith.constant 65 : index
    %230 = memref.load %arg1[%c65] : memref<111xf32, #tpu.memory_space<smem>>
    %231 = vector.broadcast %230 : f32 to vector<1x256xf32>
    %232 = arith.mulf %231, %211 : vector<1x256xf32>
    %233 = arith.addf %229, %232 : vector<1x256xf32>
    %234 = arith.negf %233 : vector<1x256xf32>
    %235 = math.exp %234 : vector<1x256xf32>
    %cst_13 = arith.constant 1.000000e+00 : f32
    %236 = vector.broadcast %cst_13 : f32 to vector<1x256xf32>
    %237 = arith.addf %236, %235 : vector<1x256xf32>
    %238 = arith.divf %236, %237 : vector<1x256xf32>
    %c71 = arith.constant 71 : index
    %239 = memref.load %arg1[%c71] : memref<111xf32, #tpu.memory_space<smem>>
    %c46 = arith.constant 46 : index
    %240 = memref.load %arg1[%c46] : memref<111xf32, #tpu.memory_space<smem>>
    %241 = vector.broadcast %240 : f32 to vector<1x256xf32>
    %242 = arith.mulf %241, %103 : vector<1x256xf32>
    %243 = vector.broadcast %239 : f32 to vector<1x256xf32>
    %244 = arith.addf %243, %242 : vector<1x256xf32>
    %c51 = arith.constant 51 : index
    %245 = memref.load %arg1[%c51] : memref<111xf32, #tpu.memory_space<smem>>
    %246 = vector.broadcast %245 : f32 to vector<1x256xf32>
    %247 = arith.mulf %246, %130 : vector<1x256xf32>
    %248 = arith.addf %244, %247 : vector<1x256xf32>
    %c56 = arith.constant 56 : index
    %249 = memref.load %arg1[%c56] : memref<111xf32, #tpu.memory_space<smem>>
    %250 = vector.broadcast %249 : f32 to vector<1x256xf32>
    %251 = arith.mulf %250, %157 : vector<1x256xf32>
    %252 = arith.addf %248, %251 : vector<1x256xf32>
    %c61 = arith.constant 61 : index
    %253 = memref.load %arg1[%c61] : memref<111xf32, #tpu.memory_space<smem>>
    %254 = vector.broadcast %253 : f32 to vector<1x256xf32>
    %255 = arith.mulf %254, %184 : vector<1x256xf32>
    %256 = arith.addf %252, %255 : vector<1x256xf32>
    %c66 = arith.constant 66 : index
    %257 = memref.load %arg1[%c66] : memref<111xf32, #tpu.memory_space<smem>>
    %258 = vector.broadcast %257 : f32 to vector<1x256xf32>
    %259 = arith.mulf %258, %211 : vector<1x256xf32>
    %260 = arith.addf %256, %259 : vector<1x256xf32>
    %261 = arith.negf %260 : vector<1x256xf32>
    %262 = math.exp %261 : vector<1x256xf32>
    %cst_14 = arith.constant 1.000000e+00 : f32
    %263 = vector.broadcast %cst_14 : f32 to vector<1x256xf32>
    %264 = arith.addf %263, %262 : vector<1x256xf32>
    %265 = arith.divf %263, %264 : vector<1x256xf32>
    %c72 = arith.constant 72 : index
    %266 = memref.load %arg1[%c72] : memref<111xf32, #tpu.memory_space<smem>>
    %c47 = arith.constant 47 : index
    %267 = memref.load %arg1[%c47] : memref<111xf32, #tpu.memory_space<smem>>
    %268 = vector.broadcast %267 : f32 to vector<1x256xf32>
    %269 = arith.mulf %268, %103 : vector<1x256xf32>
    %270 = vector.broadcast %266 : f32 to vector<1x256xf32>
    %271 = arith.addf %270, %269 : vector<1x256xf32>
    %c52 = arith.constant 52 : index
    %272 = memref.load %arg1[%c52] : memref<111xf32, #tpu.memory_space<smem>>
    %273 = vector.broadcast %272 : f32 to vector<1x256xf32>
    %274 = arith.mulf %273, %130 : vector<1x256xf32>
    %275 = arith.addf %271, %274 : vector<1x256xf32>
    %c57 = arith.constant 57 : index
    %276 = memref.load %arg1[%c57] : memref<111xf32, #tpu.memory_space<smem>>
    %277 = vector.broadcast %276 : f32 to vector<1x256xf32>
    %278 = arith.mulf %277, %157 : vector<1x256xf32>
    %279 = arith.addf %275, %278 : vector<1x256xf32>
    %c62 = arith.constant 62 : index
    %280 = memref.load %arg1[%c62] : memref<111xf32, #tpu.memory_space<smem>>
    %281 = vector.broadcast %280 : f32 to vector<1x256xf32>
    %282 = arith.mulf %281, %184 : vector<1x256xf32>
    %283 = arith.addf %279, %282 : vector<1x256xf32>
    %c67 = arith.constant 67 : index
    %284 = memref.load %arg1[%c67] : memref<111xf32, #tpu.memory_space<smem>>
    %285 = vector.broadcast %284 : f32 to vector<1x256xf32>
    %286 = arith.mulf %285, %211 : vector<1x256xf32>
    %287 = arith.addf %283, %286 : vector<1x256xf32>
    %288 = arith.negf %287 : vector<1x256xf32>
    %289 = math.exp %288 : vector<1x256xf32>
    %cst_15 = arith.constant 1.000000e+00 : f32
    %290 = vector.broadcast %cst_15 : f32 to vector<1x256xf32>
    %291 = arith.addf %290, %289 : vector<1x256xf32>
    %292 = arith.divf %290, %291 : vector<1x256xf32>
    %c73 = arith.constant 73 : index
    %293 = memref.load %arg1[%c73] : memref<111xf32, #tpu.memory_space<smem>>
    %c48 = arith.constant 48 : index
    %294 = memref.load %arg1[%c48] : memref<111xf32, #tpu.memory_space<smem>>
    %295 = vector.broadcast %294 : f32 to vector<1x256xf32>
    %296 = arith.mulf %295, %103 : vector<1x256xf32>
    %297 = vector.broadcast %293 : f32 to vector<1x256xf32>
    %298 = arith.addf %297, %296 : vector<1x256xf32>
    %c53 = arith.constant 53 : index
    %299 = memref.load %arg1[%c53] : memref<111xf32, #tpu.memory_space<smem>>
    %300 = vector.broadcast %299 : f32 to vector<1x256xf32>
    %301 = arith.mulf %300, %130 : vector<1x256xf32>
    %302 = arith.addf %298, %301 : vector<1x256xf32>
    %c58 = arith.constant 58 : index
    %303 = memref.load %arg1[%c58] : memref<111xf32, #tpu.memory_space<smem>>
    %304 = vector.broadcast %303 : f32 to vector<1x256xf32>
    %305 = arith.mulf %304, %157 : vector<1x256xf32>
    %306 = arith.addf %302, %305 : vector<1x256xf32>
    %c63 = arith.constant 63 : index
    %307 = memref.load %arg1[%c63] : memref<111xf32, #tpu.memory_space<smem>>
    %308 = vector.broadcast %307 : f32 to vector<1x256xf32>
    %309 = arith.mulf %308, %184 : vector<1x256xf32>
    %310 = arith.addf %306, %309 : vector<1x256xf32>
    %c68 = arith.constant 68 : index
    %311 = memref.load %arg1[%c68] : memref<111xf32, #tpu.memory_space<smem>>
    %312 = vector.broadcast %311 : f32 to vector<1x256xf32>
    %313 = arith.mulf %312, %211 : vector<1x256xf32>
    %314 = arith.addf %310, %313 : vector<1x256xf32>
    %315 = arith.negf %314 : vector<1x256xf32>
    %316 = math.exp %315 : vector<1x256xf32>
    %cst_16 = arith.constant 1.000000e+00 : f32
    %317 = vector.broadcast %cst_16 : f32 to vector<1x256xf32>
    %318 = arith.addf %317, %316 : vector<1x256xf32>
    %319 = arith.divf %317, %318 : vector<1x256xf32>
    %c74 = arith.constant 74 : index
    %320 = memref.load %arg1[%c74] : memref<111xf32, #tpu.memory_space<smem>>
    %c49 = arith.constant 49 : index
    %321 = memref.load %arg1[%c49] : memref<111xf32, #tpu.memory_space<smem>>
    %322 = vector.broadcast %321 : f32 to vector<1x256xf32>
    %323 = arith.mulf %322, %103 : vector<1x256xf32>
    %324 = vector.broadcast %320 : f32 to vector<1x256xf32>
    %325 = arith.addf %324, %323 : vector<1x256xf32>
    %c54 = arith.constant 54 : index
    %326 = memref.load %arg1[%c54] : memref<111xf32, #tpu.memory_space<smem>>
    %327 = vector.broadcast %326 : f32 to vector<1x256xf32>
    %328 = arith.mulf %327, %130 : vector<1x256xf32>
    %329 = arith.addf %325, %328 : vector<1x256xf32>
    %c59 = arith.constant 59 : index
    %330 = memref.load %arg1[%c59] : memref<111xf32, #tpu.memory_space<smem>>
    %331 = vector.broadcast %330 : f32 to vector<1x256xf32>
    %332 = arith.mulf %331, %157 : vector<1x256xf32>
    %333 = arith.addf %329, %332 : vector<1x256xf32>
    %c64 = arith.constant 64 : index
    %334 = memref.load %arg1[%c64] : memref<111xf32, #tpu.memory_space<smem>>
    %335 = vector.broadcast %334 : f32 to vector<1x256xf32>
    %336 = arith.mulf %335, %184 : vector<1x256xf32>
    %337 = arith.addf %333, %336 : vector<1x256xf32>
    %c69 = arith.constant 69 : index
    %338 = memref.load %arg1[%c69] : memref<111xf32, #tpu.memory_space<smem>>
    %339 = vector.broadcast %338 : f32 to vector<1x256xf32>
    %340 = arith.mulf %339, %211 : vector<1x256xf32>
    %341 = arith.addf %337, %340 : vector<1x256xf32>
    %342 = arith.negf %341 : vector<1x256xf32>
    %343 = math.exp %342 : vector<1x256xf32>
    %cst_17 = arith.constant 1.000000e+00 : f32
    %344 = vector.broadcast %cst_17 : f32 to vector<1x256xf32>
    %345 = arith.addf %344, %343 : vector<1x256xf32>
    %346 = arith.divf %344, %345 : vector<1x256xf32>
    %c100 = arith.constant 100 : index
    %347 = memref.load %arg1[%c100] : memref<111xf32, #tpu.memory_space<smem>>
    %c75 = arith.constant 75 : index
    %348 = memref.load %arg1[%c75] : memref<111xf32, #tpu.memory_space<smem>>
    %349 = vector.broadcast %348 : f32 to vector<1x256xf32>
    %350 = arith.mulf %349, %238 : vector<1x256xf32>
    %351 = vector.broadcast %347 : f32 to vector<1x256xf32>
    %352 = arith.addf %351, %350 : vector<1x256xf32>
    %c80 = arith.constant 80 : index
    %353 = memref.load %arg1[%c80] : memref<111xf32, #tpu.memory_space<smem>>
    %354 = vector.broadcast %353 : f32 to vector<1x256xf32>
    %355 = arith.mulf %354, %265 : vector<1x256xf32>
    %356 = arith.addf %352, %355 : vector<1x256xf32>
    %c85 = arith.constant 85 : index
    %357 = memref.load %arg1[%c85] : memref<111xf32, #tpu.memory_space<smem>>
    %358 = vector.broadcast %357 : f32 to vector<1x256xf32>
    %359 = arith.mulf %358, %292 : vector<1x256xf32>
    %360 = arith.addf %356, %359 : vector<1x256xf32>
    %c90 = arith.constant 90 : index
    %361 = memref.load %arg1[%c90] : memref<111xf32, #tpu.memory_space<smem>>
    %362 = vector.broadcast %361 : f32 to vector<1x256xf32>
    %363 = arith.mulf %362, %319 : vector<1x256xf32>
    %364 = arith.addf %360, %363 : vector<1x256xf32>
    %c95 = arith.constant 95 : index
    %365 = memref.load %arg1[%c95] : memref<111xf32, #tpu.memory_space<smem>>
    %366 = vector.broadcast %365 : f32 to vector<1x256xf32>
    %367 = arith.mulf %366, %346 : vector<1x256xf32>
    %368 = arith.addf %364, %367 : vector<1x256xf32>
    %369 = arith.negf %368 : vector<1x256xf32>
    %370 = math.exp %369 : vector<1x256xf32>
    %cst_18 = arith.constant 1.000000e+00 : f32
    %371 = vector.broadcast %cst_18 : f32 to vector<1x256xf32>
    %372 = arith.addf %371, %370 : vector<1x256xf32>
    %373 = arith.divf %371, %372 : vector<1x256xf32>
    %c101 = arith.constant 101 : index
    %374 = memref.load %arg1[%c101] : memref<111xf32, #tpu.memory_space<smem>>
    %c76 = arith.constant 76 : index
    %375 = memref.load %arg1[%c76] : memref<111xf32, #tpu.memory_space<smem>>
    %376 = vector.broadcast %375 : f32 to vector<1x256xf32>
    %377 = arith.mulf %376, %238 : vector<1x256xf32>
    %378 = vector.broadcast %374 : f32 to vector<1x256xf32>
    %379 = arith.addf %378, %377 : vector<1x256xf32>
    %c81 = arith.constant 81 : index
    %380 = memref.load %arg1[%c81] : memref<111xf32, #tpu.memory_space<smem>>
    %381 = vector.broadcast %380 : f32 to vector<1x256xf32>
    %382 = arith.mulf %381, %265 : vector<1x256xf32>
    %383 = arith.addf %379, %382 : vector<1x256xf32>
    %c86 = arith.constant 86 : index
    %384 = memref.load %arg1[%c86] : memref<111xf32, #tpu.memory_space<smem>>
    %385 = vector.broadcast %384 : f32 to vector<1x256xf32>
    %386 = arith.mulf %385, %292 : vector<1x256xf32>
    %387 = arith.addf %383, %386 : vector<1x256xf32>
    %c91 = arith.constant 91 : index
    %388 = memref.load %arg1[%c91] : memref<111xf32, #tpu.memory_space<smem>>
    %389 = vector.broadcast %388 : f32 to vector<1x256xf32>
    %390 = arith.mulf %389, %319 : vector<1x256xf32>
    %391 = arith.addf %387, %390 : vector<1x256xf32>
    %c96 = arith.constant 96 : index
    %392 = memref.load %arg1[%c96] : memref<111xf32, #tpu.memory_space<smem>>
    %393 = vector.broadcast %392 : f32 to vector<1x256xf32>
    %394 = arith.mulf %393, %346 : vector<1x256xf32>
    %395 = arith.addf %391, %394 : vector<1x256xf32>
    %396 = arith.negf %395 : vector<1x256xf32>
    %397 = math.exp %396 : vector<1x256xf32>
    %cst_19 = arith.constant 1.000000e+00 : f32
    %398 = vector.broadcast %cst_19 : f32 to vector<1x256xf32>
    %399 = arith.addf %398, %397 : vector<1x256xf32>
    %400 = arith.divf %398, %399 : vector<1x256xf32>
    %c102 = arith.constant 102 : index
    %401 = memref.load %arg1[%c102] : memref<111xf32, #tpu.memory_space<smem>>
    %c77 = arith.constant 77 : index
    %402 = memref.load %arg1[%c77] : memref<111xf32, #tpu.memory_space<smem>>
    %403 = vector.broadcast %402 : f32 to vector<1x256xf32>
    %404 = arith.mulf %403, %238 : vector<1x256xf32>
    %405 = vector.broadcast %401 : f32 to vector<1x256xf32>
    %406 = arith.addf %405, %404 : vector<1x256xf32>
    %c82 = arith.constant 82 : index
    %407 = memref.load %arg1[%c82] : memref<111xf32, #tpu.memory_space<smem>>
    %408 = vector.broadcast %407 : f32 to vector<1x256xf32>
    %409 = arith.mulf %408, %265 : vector<1x256xf32>
    %410 = arith.addf %406, %409 : vector<1x256xf32>
    %c87 = arith.constant 87 : index
    %411 = memref.load %arg1[%c87] : memref<111xf32, #tpu.memory_space<smem>>
    %412 = vector.broadcast %411 : f32 to vector<1x256xf32>
    %413 = arith.mulf %412, %292 : vector<1x256xf32>
    %414 = arith.addf %410, %413 : vector<1x256xf32>
    %c92 = arith.constant 92 : index
    %415 = memref.load %arg1[%c92] : memref<111xf32, #tpu.memory_space<smem>>
    %416 = vector.broadcast %415 : f32 to vector<1x256xf32>
    %417 = arith.mulf %416, %319 : vector<1x256xf32>
    %418 = arith.addf %414, %417 : vector<1x256xf32>
    %c97 = arith.constant 97 : index
    %419 = memref.load %arg1[%c97] : memref<111xf32, #tpu.memory_space<smem>>
    %420 = vector.broadcast %419 : f32 to vector<1x256xf32>
    %421 = arith.mulf %420, %346 : vector<1x256xf32>
    %422 = arith.addf %418, %421 : vector<1x256xf32>
    %423 = arith.negf %422 : vector<1x256xf32>
    %424 = math.exp %423 : vector<1x256xf32>
    %cst_20 = arith.constant 1.000000e+00 : f32
    %425 = vector.broadcast %cst_20 : f32 to vector<1x256xf32>
    %426 = arith.addf %425, %424 : vector<1x256xf32>
    %427 = arith.divf %425, %426 : vector<1x256xf32>
    %c103 = arith.constant 103 : index
    %428 = memref.load %arg1[%c103] : memref<111xf32, #tpu.memory_space<smem>>
    %c78 = arith.constant 78 : index
    %429 = memref.load %arg1[%c78] : memref<111xf32, #tpu.memory_space<smem>>
    %430 = vector.broadcast %429 : f32 to vector<1x256xf32>
    %431 = arith.mulf %430, %238 : vector<1x256xf32>
    %432 = vector.broadcast %428 : f32 to vector<1x256xf32>
    %433 = arith.addf %432, %431 : vector<1x256xf32>
    %c83 = arith.constant 83 : index
    %434 = memref.load %arg1[%c83] : memref<111xf32, #tpu.memory_space<smem>>
    %435 = vector.broadcast %434 : f32 to vector<1x256xf32>
    %436 = arith.mulf %435, %265 : vector<1x256xf32>
    %437 = arith.addf %433, %436 : vector<1x256xf32>
    %c88 = arith.constant 88 : index
    %438 = memref.load %arg1[%c88] : memref<111xf32, #tpu.memory_space<smem>>
    %439 = vector.broadcast %438 : f32 to vector<1x256xf32>
    %440 = arith.mulf %439, %292 : vector<1x256xf32>
    %441 = arith.addf %437, %440 : vector<1x256xf32>
    %c93 = arith.constant 93 : index
    %442 = memref.load %arg1[%c93] : memref<111xf32, #tpu.memory_space<smem>>
    %443 = vector.broadcast %442 : f32 to vector<1x256xf32>
    %444 = arith.mulf %443, %319 : vector<1x256xf32>
    %445 = arith.addf %441, %444 : vector<1x256xf32>
    %c98 = arith.constant 98 : index
    %446 = memref.load %arg1[%c98] : memref<111xf32, #tpu.memory_space<smem>>
    %447 = vector.broadcast %446 : f32 to vector<1x256xf32>
    %448 = arith.mulf %447, %346 : vector<1x256xf32>
    %449 = arith.addf %445, %448 : vector<1x256xf32>
    %450 = arith.negf %449 : vector<1x256xf32>
    %451 = math.exp %450 : vector<1x256xf32>
    %cst_21 = arith.constant 1.000000e+00 : f32
    %452 = vector.broadcast %cst_21 : f32 to vector<1x256xf32>
    %453 = arith.addf %452, %451 : vector<1x256xf32>
    %454 = arith.divf %452, %453 : vector<1x256xf32>
    %c104 = arith.constant 104 : index
    %455 = memref.load %arg1[%c104] : memref<111xf32, #tpu.memory_space<smem>>
    %c79 = arith.constant 79 : index
    %456 = memref.load %arg1[%c79] : memref<111xf32, #tpu.memory_space<smem>>
    %457 = vector.broadcast %456 : f32 to vector<1x256xf32>
    %458 = arith.mulf %457, %238 : vector<1x256xf32>
    %459 = vector.broadcast %455 : f32 to vector<1x256xf32>
    %460 = arith.addf %459, %458 : vector<1x256xf32>
    %c84 = arith.constant 84 : index
    %461 = memref.load %arg1[%c84] : memref<111xf32, #tpu.memory_space<smem>>
    %462 = vector.broadcast %461 : f32 to vector<1x256xf32>
    %463 = arith.mulf %462, %265 : vector<1x256xf32>
    %464 = arith.addf %460, %463 : vector<1x256xf32>
    %c89 = arith.constant 89 : index
    %465 = memref.load %arg1[%c89] : memref<111xf32, #tpu.memory_space<smem>>
    %466 = vector.broadcast %465 : f32 to vector<1x256xf32>
    %467 = arith.mulf %466, %292 : vector<1x256xf32>
    %468 = arith.addf %464, %467 : vector<1x256xf32>
    %c94 = arith.constant 94 : index
    %469 = memref.load %arg1[%c94] : memref<111xf32, #tpu.memory_space<smem>>
    %470 = vector.broadcast %469 : f32 to vector<1x256xf32>
    %471 = arith.mulf %470, %319 : vector<1x256xf32>
    %472 = arith.addf %468, %471 : vector<1x256xf32>
    %c99 = arith.constant 99 : index
    %473 = memref.load %arg1[%c99] : memref<111xf32, #tpu.memory_space<smem>>
    %474 = vector.broadcast %473 : f32 to vector<1x256xf32>
    %475 = arith.mulf %474, %346 : vector<1x256xf32>
    %476 = arith.addf %472, %475 : vector<1x256xf32>
    %477 = arith.negf %476 : vector<1x256xf32>
    %478 = math.exp %477 : vector<1x256xf32>
    %cst_22 = arith.constant 1.000000e+00 : f32
    %479 = vector.broadcast %cst_22 : f32 to vector<1x256xf32>
    %480 = arith.addf %479, %478 : vector<1x256xf32>
    %481 = arith.divf %479, %480 : vector<1x256xf32>
    %c110 = arith.constant 110 : index
    %482 = memref.load %arg1[%c110] : memref<111xf32, #tpu.memory_space<smem>>
    %c105 = arith.constant 105 : index
    %483 = memref.load %arg1[%c105] : memref<111xf32, #tpu.memory_space<smem>>
    %484 = vector.broadcast %483 : f32 to vector<1x256xf32>
    %485 = arith.mulf %484, %373 : vector<1x256xf32>
    %486 = vector.broadcast %482 : f32 to vector<1x256xf32>
    %487 = arith.addf %486, %485 : vector<1x256xf32>
    %c106 = arith.constant 106 : index
    %488 = memref.load %arg1[%c106] : memref<111xf32, #tpu.memory_space<smem>>
    %489 = vector.broadcast %488 : f32 to vector<1x256xf32>
    %490 = arith.mulf %489, %400 : vector<1x256xf32>
    %491 = arith.addf %487, %490 : vector<1x256xf32>
    %c107 = arith.constant 107 : index
    %492 = memref.load %arg1[%c107] : memref<111xf32, #tpu.memory_space<smem>>
    %493 = vector.broadcast %492 : f32 to vector<1x256xf32>
    %494 = arith.mulf %493, %427 : vector<1x256xf32>
    %495 = arith.addf %491, %494 : vector<1x256xf32>
    %c108 = arith.constant 108 : index
    %496 = memref.load %arg1[%c108] : memref<111xf32, #tpu.memory_space<smem>>
    %497 = vector.broadcast %496 : f32 to vector<1x256xf32>
    %498 = arith.mulf %497, %454 : vector<1x256xf32>
    %499 = arith.addf %495, %498 : vector<1x256xf32>
    %c109 = arith.constant 109 : index
    %500 = memref.load %arg1[%c109] : memref<111xf32, #tpu.memory_space<smem>>
    %501 = vector.broadcast %500 : f32 to vector<1x256xf32>
    %502 = arith.mulf %501, %481 : vector<1x256xf32>
    %503 = arith.addf %499, %502 : vector<1x256xf32>
    %c0_23 = arith.constant 0 : index
    %c0_24 = arith.constant 0 : index
    %504 = vector.load %arg4[%c0_23, %c0_24] : memref<1x256xf32, #tpu.memory_space<vmem>>, vector<1x256xf32>
    tpu.vector_store %arg4[%c0_23, %c0_24], %503 {strides = array<i32>} : memref<1x256xf32, #tpu.memory_space<vmem>>, vector<1x256xf32>,
    return
  }
  func.func @transform_0(%arg0: i32) -> i32 {
    %c0_i32 = arith.constant 0 : i32
    %c0_i32_0 = arith.constant 0 : i32
    return %c0_i32 : i32
  }
  func.func @transform_1(%arg0: i32) -> (i32, i32) {
    %c0_i32 = arith.constant 0 : i32
    %c0_i32_0 = arith.constant 0 : i32
    return %c0_i32, %arg0 : i32, i32
  }
  func.func @transform_2(%arg0: i32) -> (i32, i32) {
    %c0_i32 = arith.constant 0 : i32
    %c0_i32_0 = arith.constant 0 : i32
    return %c0_i32, %arg0 : i32, i32
  }
  func.func @transform_3(%arg0: i32) -> (i32, i32) {
    %c0_i32 = arith.constant 0 : i32
    %c0_i32_0 = arith.constant 0 : i32
    return %c0_i32, %arg0 : i32, i32
  }
}

</mosaic_0001>

<bundles_post_ra>
// kernel: tpu_custom_call.1
= control target key start
LH: loop header
LB: loop body
LE: loop exit
PB: predicated region body
PF: predicated region fallthrough
CT: control target
= control target key end

     0   :  { %s1831_s0 = inlined_call_operand.hbm [shape: f32[111], index: 0, kind: input, shape index: {}]   ;;  %s1832_s1 = inlined_call_operand.hbm [shape: f32[1,1024], index: 1, kind: input, shape index: {}]   ;;  %s1833_s2 = inlined_call_operand.hbm [shape: f32[1,1024], index: 2, kind: input, shape index: {}]   ;;  %s1834_s3 = inlined_call_operand.hbm [shape: f32[1,1024], index: 3, kind: output, shape index: {}]  }
   0x1   :  { %1850 = sst [smem:[#allocation23_spill]] %s1831_s0 }
   0x2   :  { %1851 = sst [smem:[#allocation24_spill]] %s1832_s1 }
   0x3   :  { %1852 = sst [smem:[#allocation25_spill]] %s1833_s2 }
   0x4   :  { %1853 = sst [smem:[#allocation26_spill]] %s1834_s3 }
   0x5   :  { %8 = vsyncpa [#allocation5], 0 }
   0x6   :  { %9 = vsyncpa [#allocation3], 0 }
   0x7   :  { %11 = vsyncpa [#allocation3 + $0x1], 0 }
   0x8   :  { %12 = vsyncpa [#allocation8], 0 }
   0x9   :  { %14 = vsyncpa [#allocation8 + $0x1], 0 }
   0xa   :  { %15 = vsyncpa [#allocation4], 0 }
   0xb   :  { %17 = vsyncpa [#allocation4 + $0x1], 0  ;;  %s1349_s12 = smov 0   ;;  %s1351_s13 = smov 0  }
   0xc   :  { %s1353_s14 = smov 0   ;;  %s1355_s15 = smov 0  }
   0xd LB: > { %1854 = sst [smem:[#allocation14_spill]] %s1311_s12  ;;  %s1370_s16 = sadd.s32 4294967295, %s1323_s15   ;;  %s1323_s15 = sphi %s1355_s15, %s1883_s15   ;;  %s1319_s14 = sphi %s1353_s14, %s1886_s14   ;;  %s1315_s13 = sphi %s1351_s13, %s1885_s13   ;;  %s1311_s12 = sphi %s1349_s12, %s1884_s12  }
   0xe   : > { %1855 = sst [smem:[#allocation15_spill]] %s1315_s13  ;;  %s889_s17 = sadd.s32 4294967294, %s1323_s15  }
   0xf   : > { %1856 = sst [smem:[#allocation16_spill]] %s1319_s14  ;;  %s1374_s18 = sadd.s32 1, %s1323_s15  }
  0x10   : > { %1857 = sst [smem:[#allocation17_spill]] %s1323_s15  ;;  %s51_s19 = sadd.s32 1, %s1319_s14 }
  0x11   : > { %1858 = sst [smem:[#allocation18_spill]] %s1374_s18  ;;  %s48_s20 = ssub.s32 %s1323_s15, %s1374_s18 }
  0x12   : > { %p58_p0 = scmp.ne.s32.totalorder %s1319_s14, %s1315_s13  ;;  %p49_p1 = scmp.eq.s32.totalorder %s48_s20, 0 }
  0x13   : > { %p64_p2 = scmp.ne.s32.totalorder %s1315_s13, %s1311_s12  ;;  %p1835_p3 = scmp.eq.s32.totalorder %s1370_s16, 0 }
  0x14   : > { %p114_p4 = scmp.eq.s32.totalorder %s1370_s16, 3  ;;  %p120_p7 = scmp.eq.s32.totalorder %s889_s17, 3 }
  0x15   : > { %s1386_s21 = scalar_select %p49_p1, %s1319_s14, %s51_s19  }
  0x16   : > { %p1390_p5 = por %p1835_p3, %p64_p2  ;;  %p1397_p6 = por %p114_p4, %p58_p0 }
  0x17   : > { %1859 = sst [smem:[#allocation19_spill]] %s1386_s21  ;;  %p890_p8 = scmp.ge.s32.totalorder %s1323_s15, 1 }
  0x18   : > { %s1860_s22 = scalar_select %p1390_p5, 1, 0 }
  0x19   : > { %s1861_s23 = scalar_select %p1397_p6, 1, 0 }
  0x1a   : > { %p127_p9 = scmp.lt.s32.totalorder %s1323_s15, 5  ;;  %p1403_p10 = por %p120_p7, %p64_p2 }
  0x1b   : > { %1862 = sst [smem:[#allocation20_spill]] %s1861_s23  ;;  %p59_p12 = scmp.eq.s32.totalorder %s1323_s15, 0 }
  0x1c   : > { %s1863_s24 = scalar_select %p1403_p10, 1, 0 }
  0x1d   : > { %p1407_p11 = pnand %p890_p8, %p127_p9  ;;  %p1068_p13 = scmp.lt.s32.totalorder %s1323_s15, 4 }
  0x1e   : > { %1864 = sst [smem:[#allocation21_spill]] %s1863_s24  ;;  %s1416_s26 = sand.u32 1, %s1319_s14  }
  0x1f   : > { %s1865_s25 = scalar_select %p1407_p11, 1, 0 }
  0x20   : > { %p1052_p1 = pneg %p1407_p11  ;;  %p60_p4 = por %p59_p12, %p58_p0 }
  0x21   : > { %s893_s27 = sshll.u32 %s1416_s26, 1  ;;  %s1039_s28 = sshll.u32 %s1323_s15, 5 }
  0x22   : > { %p1053_p2 = pnand %p1052_p1, %p1835_p3  ;;  %s1866_s1 = sld [smem:[#allocation24_spill]] }
  0x23   : > { %s1325_s5 = smov [#allocation2]   ;;  %s1867_s0 = sld [smem:[#allocation23_spill]] }
  0x24   : > { %s153_s8 = scalar_lea.vmem [#allocation6], %s893_s27  ;;  %p1437_p0 = pnand %p1068_p13, %p60_p4 }
  0x25   : > { %s161_s9 = sshll.u32 %s153_s8, 4  ;;  %s150_s11 = scalar_lea.sflag [#allocation3], %s1416_s26  ;;  %s162_s9 = int_to_ptr.vmem [resolvable:$true] %s161_s9 }
  0x26   : > { %p1197_p8 = pneg %p1437_p0 }
  0x28   : > { %s1430_s4 = scalar_lea.hbm %s1866_s1, %s1039_s28  ;;  %s1200_s29 = scalar_lea.hbm %s1866_s1, 128 }
  0x29   : > { %1055 = dma.hbm_to_smem (!%p1053_p2), %s1867_s0, 16, %s1325_s5, [#allocation5]  }
  0x2a   : > { %s1195_s17 = scalar_lea.hbm %s1430_s4, 32  ;;  %p1201_p13 = scmp.lt.s32.totalorder %s1430_s4, %s1866_s1 }
  0x2b   : > { %p1196_p7 = scmp.ne.s32.totalorder %s1430_s4, %s1195_s17  ;;  %p1202_p1 = scmp.lt.s32.totalorder %s1200_s29, %s1195_s17 }
  0x2d   : > { %p1198_p9 = pnand %p1197_p8, %p1196_p7  ;;  %p1203_p4 = por %p1202_p1, %p1201_p13 }
  0x2f   : > { %p1199_p12 = pneg %p1198_p9 }
  0x31   : > { %p1204_p2 = pnand %p1203_p4, %p1199_p12 }
  0x33   : > { %1207 = shalt.err (!%p1204_p2)
}
  0x34   : > { %s1208_s6 = scalar_lea.vmem %s162_s9, 32  ;;  %s1326_s7 = smov [#allocation6]  }
  0x35   : > { %p1209_p3 = scmp.ne.s32.totalorder %s162_s9, %s1208_s6  ;;  %s1213_s8 = sshll.u32 %s1326_s7, 4  ;;  %s1214_s8 = int_to_ptr.vmem [resolvable:$false] %s1213_s8 }
  0x36   : > { %s1215_s19 = scalar_lea.vmem %s1214_s8, 64  ;;  %p1216_p9 = scmp.lt.s32.totalorder %s162_s9, %s1214_s8 }
  0x37   : > { %p1211_p10 = pnand %p1209_p3, %p1197_p8  ;;  %p1217_p6 = scmp.lt.s32.totalorder %s1215_s19, %s1208_s6 }
  0x39   : > { %p1212_p7 = pneg %p1211_p10  ;;  %p1218_p5 = por %p1217_p6, %p1216_p9 }
  0x3b   : > { %p1219_p11 = pnand %p1218_p5, %p1212_p7 }
  0x3d   : > { %1222 = shalt.err (!%p1219_p11)
}
  0x3e   : > { %1059 = dma.hbm_to_vmem [thread:$0]  (!%p1437_p0), %s1430_s4, 32, %s162_s9, %s150_s11  }
  0x3f   : > { %s1869_s2 = sld [smem:[#allocation25_spill]]  ;;  %s172_s30 = scalar_lea.vmem [#allocation7], %s893_s27 }
  0x40   : > { %s180_s5 = sshll.u32 %s172_s30, 4  ;;  %s169_s6 = scalar_lea.sflag [#allocation8], %s1416_s26  ;;  %s181_s5 = int_to_ptr.vmem [resolvable:$true] %s180_s5 }
  0x45   : > { %s1467_s29 = scalar_lea.hbm %s1869_s2, %s1039_s28  ;;  %s1228_s11 = scalar_lea.hbm %s1869_s2, 128 }
  0x46   : > { %s1223_s7 = scalar_lea.hbm %s1467_s29, 32  ;;  %p1229_p10 = scmp.lt.s32.totalorder %s1467_s29, %s1869_s2 }
  0x47   : > { %p1224_p3 = scmp.ne.s32.totalorder %s1467_s29, %s1223_s7  ;;  %p1230_p11 = scmp.lt.s32.totalorder %s1228_s11, %s1223_s7 }
  0x49   : > { %p1226_p5 = pnand %p1224_p3, %p1197_p8  ;;  %p1231_p12 = por %p1230_p11, %p1229_p10 }
  0x4b   : > { %p1227_p6 = pneg %p1226_p5 }
  0x4d   : > { %p1232_p13 = pnand %p1231_p12, %p1227_p6 }
  0x4f   : > { %1235 = shalt.err (!%p1232_p13)
}
  0x50   : > { %s1236_s27 = scalar_lea.vmem %s181_s5, 32  ;;  %s1327_s26 = smov [#allocation7]  }
  0x51   : > { %p1237_p1 = scmp.ne.s32.totalorder %s181_s5, %s1236_s27  ;;  %s1241_s19 = sshll.u32 %s1327_s26, 4  ;;  %s1242_s19 = int_to_ptr.vmem [resolvable:$false] %s1241_s19 }
  0x52   : > { %s1243_s17 = scalar_lea.vmem %s1242_s19, 64  ;;  %p1244_p7 = scmp.lt.s32.totalorder %s181_s5, %s1242_s19 }
  0x53   : > { %p1239_p4 = pnand %p1237_p1, %p1197_p8  ;;  %p1245_p9 = scmp.lt.s32.totalorder %s1243_s17, %s1236_s27 }
  0x55   : > { %p1240_p2 = pneg %p1239_p4  ;;  %p1246_p3 = por %p1245_p9, %p1244_p7 }
  0x57   : > { %p1247_p5 = pnand %p1246_p3, %p1240_p2 }
  0x59   : > { %1250 = shalt.err (!%p1247_p5)
}
  0x5a   : > { %1062 = dma.hbm_to_vmem [thread:$0]  (!%p1437_p0), %s1467_s29, 32, %s181_s5, %s169_s6  }
  0x5b   : > { %p1870_p6 = scmp.ne.s32.totalorder %s1865_s25, 0 }
  0x5d   : > { %189 = sbr.rel (%p1870_p6) target bundleno = 316 (0x13c), region = 32 }
  0x62   : > { %p1871_p10 = scmp.eq.s32.totalorder %s1370_s16, 0 }
  0x64   : > { %1294 = dma.done.wait (%p1871_p10), [#allocation5], 16   ;;  %p1872_p8 = pmov %p1871_p10 }
  0x65   : > { %s1497_s20 = sand.u32 1, %s1315_s13   ;;  %p1874_p0 = scmp.ne.s32.totalorder %s1860_s22, 0 }
  0x66   : > { %1296 = vsyncadd (%p1872_p8), [#allocation5], 4294967280  ;;  %1873 = sst [smem:[#allocation22_spill]] %s1497_s20  ;;  %s1500_s30 = sshll.u32 %s1497_s20, 1 }
  0x67   : > { %s196_s10 = scalar_lea.sflag [#allocation3], %s1497_s20  ;;  %s199_s29 = scalar_lea.vmem [#allocation6], %s1500_s30 }
  0x68   : > { %1298 = dma.done.wait (%p1874_p0), %s196_s10, 32  }
  0x69   : > { %1300 = vsyncadd (%p1874_p0), %s196_s10, 4294967264  ;;  %s205_s25 = scalar_lea.sflag [#allocation8], %s1497_s20  ;;  %s208_s5 = scalar_lea.vmem [#allocation7], %s1500_s30 }
  0x6a   : > { %1302 = dma.done.wait (%p1874_p0), %s205_s25, 32  }
  0x6b   : > { %1304 = vsyncadd (%p1874_p0), %s205_s25, 4294967264 }
  0x6c   : > { %213 = sfence }
  0x6d   : > { %s904_s6 = sld [smem:[#allocation2 + $0xa]]  ;;  %v240_v0 = vld [vmem:[%s199_s29] sm:$0x3]  ;;  %v241_v1 = vld [vmem:[%s208_s5] sm:$0x3] }
  0x6e   : > { %s243_s7 = sld [smem:[#allocation2]] }
  0x6f   : > { %s905_s4 = sld [smem:[#allocation2 + $0x5]] }
  0x70   : > { %s907_s9 = sld [smem:[#allocation2 + $0xb]] }
  0x71   : > { %s908_s11 = sld [smem:[#allocation2 + $0x1]] }
  0x72   : > { %s909_s28 = sld [smem:[#allocation2 + $0x6]] }
  0x73   : > { %s911_s8 = sld [smem:[#allocation2 + $0xc]]  ;;  %v246_v3 = vstv %s904_s6 }
  0x74   : > { %v244_v2 = vstv %s243_s7  ;;  %s912_s27 = sld [smem:[#allocation2 + $0x2]] }
  0x75   : > { %v245_v4 = vmul.f32 %v244_v2, %v240_v0  ;;  %v249_v5 = vstv %s905_s4  ;;  %s913_s26 = sld [smem:[#allocation2 + $0x7]] }
  0x76   : > { %v250_v6 = vmul.f32 %v249_v5, %v241_v1  ;;  %s1514_s19 = sld [smem:[#allocation2 + $0xd]]  ;;  %v262_v9 = vstv %s907_s9 }
  0x77   : > { %v247_v7 = vadd.f32 %v246_v3, %v245_v4  ;;  %v260_v8 = vstv %s908_s11  ;;  %s916_s22 = sld [smem:[#allocation2 + $0x3]] }
  0x78   : > { %v261_v10 = vmul.f32 %v260_v8, %v240_v0  ;;  %v265_v11 = vstv %s909_s28  ;;  %s917_s17 = sld [smem:[#allocation2 + $0x8]] }
  0x79   : > { %v251_v12 = vadd.f32 %v250_v6, %v247_v7  ;;  %v266_v13 = vmul.f32 %v265_v11, %v241_v1  ;;  %s1516_s10 = sld [smem:[#allocation2 + $0xe]]  ;;  %v278_v16 = vstv %s911_s8 }
  0x7a   : > { %v263_v14 = vadd.f32 %v262_v9, %v261_v10  ;;  %v276_v15 = vstv %s912_s27  ;;  %s920_s29 = sld [smem:[#allocation2 + $0x4]] }
  0x7b   : > { %v906_v17 = vmul.f32 -1.442695, %v251_v12  ;;  %v277_v18 = vmul.f32 %v276_v15, %v240_v0  ;;  %v281_v19 = vstv %s913_s26  ;;  %s921_s25 = sld [smem:[#allocation2 + $0x9]] }
  0x7c   : > { %v267_v20 = vadd.f32 %v266_v13, %v263_v14  ;;  %v282_v21 = vmul.f32 %v281_v19, %v241_v1  ;;  %v294_v24 = vstv %s1514_s19  ;;  %s1519_s5 = sld [smem:[#allocation2 + $0x28]] }
  0x7d   : > { %1104 = vpow2.f32 %v906_v17  ;;  %v279_v22 = vadd.f32 %v278_v16, %v277_v18  ;;  %v292_v23 = vstv %s916_s22  ;;  %s1521_s6 = sld [smem:[#allocation2 + $0xf]] }
  0x7e   : > { %v910_v25 = vmul.f32 -1.442695, %v267_v20  ;;  %v293_v26 = vmul.f32 %v292_v23, %v240_v0  ;;  %v297_v27 = vstv %s917_s17  ;;  %s1523_s7 = sld [smem:[#allocation2 + $0x14]] }
  0x7f   : > { %v283_v28 = vadd.f32 %v282_v21, %v279_v22  ;;  %v298_v29 = vmul.f32 %v297_v27, %v241_v1  ;;  %v310_v32 = vstv %s1516_s10  ;;  %s1526_s4 = sld [smem:[#allocation2 + $0x19]] }
  0x80   : > { %1106 = vpow2.f32 %v910_v25  ;;  %v295_v30 = vadd.f32 %v294_v24, %v293_v26  ;;  %v308_v31 = vstv %s920_s29  ;;  %s1528_s9 = sld [smem:[#allocation2 + $0x1e]] }
  0x81   : > { %v914_v33 = vmul.f32 -1.442695, %v283_v28  ;;  %v309_v34 = vmul.f32 %v308_v31, %v240_v0  ;;  %v313_v35 = vstv %s921_s25  ;;  %s1530_s11 = sld [smem:[#allocation2 + $0x23]] }
  0x82   : > { %v299_v36 = vadd.f32 %v298_v29, %v295_v30  ;;  %v314_v37 = vmul.f32 %v313_v35, %v241_v1  ;;  %s1532_s28 = sld [smem:[#allocation2 + $0x29]]  ;;  %v326_v51 = vstv %s1519_s5 }
  0x83   : > { %1108 = vpow2.f32 %v914_v33  ;;  %v311_v38 = vadd.f32 %v310_v32, %v309_v34  ;;  %s1534_s8 = sld [smem:[#allocation2 + $0x10]]  ;;  %v324_v50 = vstv %s1521_s6 }
  0x84   : > { %v918_v39 = vmul.f32 -1.442695, %v299_v36  ;;  %s1536_s27 = sld [smem:[#allocation2 + $0x15]]  ;;  %v329_v52 = vstv %s1523_s7 }
  0x85   : > { %v315_v40 = vadd.f32 %v314_v37, %v311_v38  ;;  %s1538_s26 = sld [smem:[#allocation2 + $0x1a]]  ;;  %v333_v53 = vstv %s1526_s4 }
  0x86   : > { %1110 = vpow2.f32 %v918_v39  ;;  %s1540_s19 = sld [smem:[#allocation2 + $0x1f]]  ;;  %v337_v55 = vstv %s1528_s9 }
  0x87   : > { %v922_v41 = vmul.f32 -1.442695, %v315_v40  ;;  %s1542_s22 = sld [smem:[#allocation2 + $0x24]]  ;;  %v341_v56 = vstv %s1530_s11 }
  0x88   : > { %s1544_s17 = sld [smem:[#allocation2 + $0x2a]]  ;;  %v354_v57 = vstv %s1532_s28 }
  0x89   : > { %1112 = vpow2.f32 %v922_v41  ;;  %s1546_s10 = sld [smem:[#allocation2 + $0x11]]  ;;  %v352_v59 = vstv %s1534_s8 }
  0x8a   : > { %v1105_v42 = vpop.eup %1104  ;;  %s1548_s29 = sld [smem:[#allocation2 + $0x16]]  ;;  %v357_v60 = vstv %s1536_s27 }
  0x8b   : > { %v255_v43 = vadd.f32 1.0, %v1105_v42  ;;  %s1550_s25 = sld [smem:[#allocation2 + $0x1b]]  ;;  %v361_v61 = vstv %s1538_s26 }
  0x8c   : > { %s1552_s0 = sld [smem:[#allocation2 + $0x20]]  ;;  %v365_v62 = vstv %s1540_s19 }
  0x8d   : > { %v1107_v44 = vpop.eup %1106  ;;  %1114 = vrcp.f32 %v255_v43  ;;  %s1554_s1 = sld [smem:[#allocation2 + $0x25]]  ;;  %v369_v63 = vstv %s1542_s22 }
  0x8e   : > { %v271_v45 = vadd.f32 1.0, %v1107_v44  ;;  %s1556_s2 = sld [smem:[#allocation2 + $0x2b]]  ;;  %v382_v2 = vstv %s1544_s17 }
  0x8f   : > { %s1558_s21 = sld [smem:[#allocation2 + $0x12]]  ;;  %v380_v0 = vstv %s1546_s10 }
  0x90   : > { %v1109_v46 = vpop.eup %1108  ;;  %1116 = vrcp.f32 %v271_v45  ;;  %s1560_s14 = sld [smem:[#allocation2 + $0x17]]  ;;  %v385_v3 = vstv %s1548_s29 }
  0x91   : > { %v287_v47 = vadd.f32 1.0, %v1109_v46  ;;  %s1562_s13 = sld [smem:[#allocation2 + $0x1c]]  ;;  %v389_v4 = vstv %s1550_s25 }
  0x92   : > { %s1564_s18 = sld [smem:[#allocation2 + $0x21]]  ;;  %v393_v6 = vstv %s1552_s0 }
  0x93   : > { %v1111_v48 = vpop.eup %1110  ;;  %1118 = vrcp.f32 %v287_v47  ;;  %s1566_s24 = sld [smem:[#allocation2 + $0x2c]]  ;;  %v397_v7 = vstv %s1554_s1 }
  0x94   : > { %v303_v49 = vadd.f32 1.0, %v1111_v48  ;;  %s1572_s12 = sld [smem:[#allocation2 + $0x13]]  ;;  %v410_v8 = vstv %s1556_s2 }
  0x95   : > { %s1577_s15 = sld [smem:[#allocation2 + $0x18]]  ;;  %v408_v1 = vstv %s1558_s21 }
  0x96   : > { %v1113_v54 = vpop.eup %1112  ;;  %1120 = vrcp.f32 %v303_v49  ;;  %s1582_s5 = sld [smem:[#allocation2 + $0x1d]]  ;;  %v413_v9 = vstv %s1560_s14 }
  0x97   : > { %v319_v58 = vadd.f32 1.0, %v1113_v54  ;;  %s1591_s6 = sld [smem:[#allocation2 + $0x26]]  ;;  %v417_v14 = vstv %s1562_s13 }
  0x98   : > { %s1597_s7 = sld [smem:[#allocation2 + $0x22]]  ;;  %v421_v15 = vstv %s1564_s18 }
  0x99   : > { %1122 = vrcp.f32 %v319_v58  ;;  %s1603_s0 = sld [smem:[#allocation2 + $0x27]]  ;;  %v438_v28 = vstv %s1566_s24 }
  0x9a   : > { %v1115_v5 = vpop.eup %1114  ;;  %v436_v16 = vstv %s1572_s12  ;;  %s1612_s1 = sld [smem:[#allocation2 + $0x46]] }
  0x9b   : > { %v325_v10 = vmul.f32 %v1115_v5, %v324_v50  ;;  %v353_v11 = vmul.f32 %v1115_v5, %v352_v59  ;;  %v381_v12 = vmul.f32 %v1115_v5, %v380_v0  ;;  %v409_v13 = vmul.f32 %v1115_v5, %v408_v1  ;;  %s1618_s2 = sld [smem:[#allocation2 + $0x2d]] }
  0x9c   : > { %v441_v17 = vstv %s1577_s15  ;;  %v437_v27 = vmul.f32 %v1115_v5, %v436_v16  ;;  %v445_v30 = vstv %s1582_s5  ;;  %s1620_s12 = sld [smem:[#allocation2 + $0x32]] }
  0x9d   : > { %v1117_v18 = vpop.eup %1116  ;;  %v327_v19 = vadd.f32 %v326_v51, %v325_v10  ;;  %v355_v20 = vadd.f32 %v354_v57, %v353_v11  ;;  %v383_v21 = vadd.f32 %v382_v2, %v381_v12  ;;  %v411_v22 = vadd.f32 %v410_v8, %v409_v13  ;;  %s1622_s13 = sld [smem:[#allocation2 + $0x37]] }
  0x9e   : > { %v330_v23 = vmul.f32 %v1117_v18, %v329_v52  ;;  %v358_v24 = vmul.f32 %v1117_v18, %v357_v60  ;;  %v386_v25 = vmul.f32 %v1117_v18, %v385_v3  ;;  %v414_v26 = vmul.f32 %v1117_v18, %v413_v9  ;;  %s1624_s14 = sld [smem:[#allocation2 + $0x3c]] }
  0x9f   : > { %v442_v29 = vmul.f32 %v1117_v18, %v441_v17  ;;  %v425_v40 = vstv %s1591_s6  ;;  %v439_v41 = vadd.f32 %v438_v28, %v437_v27  ;;  %v449_v43 = vstv %s1597_s7  ;;  %s1626_s15 = sld [smem:[#allocation2 + $0x41]] }
  0xa0   : > { %v1119_v31 = vpop.eup %1118  ;;  %v331_v32 = vadd.f32 %v330_v23, %v327_v19  ;;  %v359_v33 = vadd.f32 %v358_v24, %v355_v20  ;;  %v387_v34 = vadd.f32 %v386_v25, %v383_v21  ;;  %v415_v35 = vadd.f32 %v414_v26, %v411_v22  ;;  %s1628_s18 = sld [smem:[#allocation2 + $0x47]] }
  0xa1   : > { %v334_v36 = vmul.f32 %v1119_v31, %v333_v53  ;;  %v362_v37 = vmul.f32 %v1119_v31, %v361_v61  ;;  %v390_v38 = vmul.f32 %v1119_v31, %v389_v4  ;;  %v418_v39 = vmul.f32 %v1119_v31, %v417_v14  ;;  %s1630_s21 = sld [smem:[#allocation2 + $0x2e]] }
  0xa2   : > { %v446_v42 = vmul.f32 %v1119_v31, %v445_v30  ;;  %v443_v53 = vadd.f32 %v442_v29, %v439_v41  ;;  %v453_v57 = vstv %s1603_s0  ;;  %s1632_s24 = sld [smem:[#allocation2 + $0x33]]  ;;  %v464_v24 = vstv %s1618_s2 }
  0xa3   : > { %v1121_v44 = vpop.eup %1120  ;;  %v335_v45 = vadd.f32 %v334_v36, %v331_v32  ;;  %v363_v46 = vadd.f32 %v362_v37, %v359_v33  ;;  %v391_v47 = vadd.f32 %v390_v38, %v387_v34  ;;  %v419_v48 = vadd.f32 %v418_v39, %v415_v35  ;;  %s1634_s4 = sld [smem:[#allocation2 + $0x38]] }
  0xa4   : > { %v338_v49 = vmul.f32 %v1121_v44, %v337_v55  ;;  %v366_v50 = vmul.f32 %v1121_v44, %v365_v62  ;;  %v394_v51 = vmul.f32 %v1121_v44, %v393_v6  ;;  %v422_v52 = vmul.f32 %v1121_v44, %v421_v15  ;;  %s1636_s9 = sld [smem:[#allocation2 + $0x3d]] }
  0xa5   : > { %v450_v54 = vmul.f32 %v1121_v44, %v449_v43  ;;  %v447_v55 = vadd.f32 %v446_v42, %v443_v53  ;;  %s1638_s11 = sld [smem:[#allocation2 + $0x42]]  ;;  %v466_v25 = vstv %s1612_s1  ;;  %v469_v26 = vstv %s1620_s12 }
  0xa6   : > { %v1123_v58 = vpop.eup %1122  ;;  %v339_v59 = vadd.f32 %v338_v49, %v335_v45  ;;  %v367_v60 = vadd.f32 %v366_v50, %v363_v46  ;;  %v395_v61 = vadd.f32 %v394_v51, %v391_v47  ;;  %v423_v0 = vadd.f32 %v422_v52, %v419_v48  ;;  %s1640_s28 = sld [smem:[#allocation2 + $0x48]] }
  0xa7   : > { %v342_v1 = vmul.f32 %v1123_v58, %v341_v56  ;;  %v370_v2 = vmul.f32 %v1123_v58, %v369_v63  ;;  %v398_v3 = vmul.f32 %v1123_v58, %v397_v7  ;;  %v426_v4 = vmul.f32 %v1123_v58, %v425_v40  ;;  %s1642_s8 = sld [smem:[#allocation2 + $0x2f]] }
  0xa8   : > { %v454_v62 = vmul.f32 %v1123_v58, %v453_v57  ;;  %v451_v10 = vadd.f32 %v450_v54, %v447_v55  ;;  %s1644_s27 = sld [smem:[#allocation2 + $0x34]]  ;;  %v473_v27 = vstv %s1622_s13  ;;  %v477_v28 = vstv %s1624_s14 }
  0xa9   : > { %v343_v5 = vadd.f32 %v342_v1, %v339_v59  ;;  %v371_v6 = vadd.f32 %v370_v2, %v367_v60  ;;  %v399_v8 = vadd.f32 %v398_v3, %v395_v61  ;;  %v427_v9 = vadd.f32 %v426_v4, %v423_v0  ;;  %s1646_s26 = sld [smem:[#allocation2 + $0x39]] }
  0xaa   : > { %v455_v12 = vadd.f32 %v454_v62, %v451_v10  ;;  %s1648_s19 = sld [smem:[#allocation2 + $0x3e]]  ;;  %v481_v29 = vstv %s1626_s15  ;;  %v492_v30 = vstv %s1630_s21  ;;  %v494_v31 = vstv %s1628_s18 }
  0xab   : > { %v929_v56 = vmul.f32 -1.442695, %v343_v5  ;;  %v936_v11 = vmul.f32 -1.442695, %v371_v6  ;;  %v943_v63 = vmul.f32 -1.442695, %v399_v8  ;;  %v497_v32 = vstv %s1632_s24 }
  0xac   : > { %v950_v7 = vmul.f32 -1.442695, %v427_v9  ;;  %v957_v13 = vmul.f32 -1.442695, %v455_v12  ;;  %s1650_s22 = sld [smem:[#allocation2 + $0x43]]  ;;  %v501_v33 = vstv %s1634_s4  ;;  %v505_v34 = vstv %s1636_s9 }
  0xad   : > { %1124 = vpow2.f32 %v929_v56  ;;  %s1652_s17 = sld [smem:[#allocation2 + $0x49]]  ;;  %v509_v35 = vstv %s1638_s11  ;;  %v520_v36 = vstv %s1642_s8  ;;  %v522_v37 = vstv %s1640_s28 }
  0xae   : > { %1126 = vpow2.f32 %v936_v11  ;;  %s1654_s10 = sld [smem:[#allocation2 + $0x30]]  ;;  %v525_v38 = vstv %s1644_s27 }
  0xaf   : > { %1128 = vpow2.f32 %v943_v63  ;;  %s1656_s29 = sld [smem:[#allocation2 + $0x35]]  ;;  %v529_v39 = vstv %s1646_s26 }
  0xb0   : > { %1130 = vpow2.f32 %v950_v7  ;;  %s1658_s25 = sld [smem:[#allocation2 + $0x3a]]  ;;  %v533_v40 = vstv %s1648_s19 }
  0xb1   : > { %1132 = vpow2.f32 %v957_v13  ;;  %s1660_s5 = sld [smem:[#allocation2 + $0x3f]] }
  0xb2   : > { %s1662_s6 = sld [smem:[#allocation2 + $0x44]]  ;;  %v537_v41 = vstv %s1650_s22 }
  0xb3   : > { %s1664_s7 = sld [smem:[#allocation2 + $0x4a]]  ;;  %v550_v43 = vstv %s1652_s17 }
  0xb4   : > { %s1666_s0 = sld [smem:[#allocation2 + $0x31]]  ;;  %v548_v42 = vstv %s1654_s10 }
  0xb5   : > { %s1668_s3 = sld [smem:[#allocation2 + $0x36]]  ;;  %v553_v44 = vstv %s1656_s29 }
  0xb6   : > { %s1670_s23 = sld [smem:[#allocation2 + $0x3b]]  ;;  %v557_v45 = vstv %s1658_s25 }
  0xb7   : > { %s1672_s20 = sld [smem:[#allocation2 + $0x40]]  ;;  %v561_v46 = vstv %s1660_s5 }
  0xb8   : > { %v565_v47 = vstv %s1662_s6  ;;  %s1703_s1 = sld [smem:[#allocation2 + $0x45]] }
  0xb9   : > { %v578_v50 = vstv %s1664_s7  ;;  %s1712_s2 = sld [smem:[#allocation2 + $0x55]] }
  0xba   : > { %v1125_v14 = vpop.eup %1124  ;;  %v576_v49 = vstv %s1666_s0  ;;  %s1714_s12 = sld [smem:[#allocation2 + $0x5a]] }
  0xbb   : > { %v1127_v15 = vpop.eup %1126  ;;  %v347_v16 = vadd.f32 1.0, %v1125_v14  ;;  %v581_v51 = vstv %s1668_s3  ;;  %s1705_s3 = sld [smem:[#allocation2 + $0x64]] }
  0xbc   : > { %v1129_v17 = vpop.eup %1128  ;;  %v375_v18 = vadd.f32 1.0, %v1127_v15  ;;  %v585_v52 = vstv %s1670_s23  ;;  %s1707_s23 = sld [smem:[#allocation2 + $0x4b]] }
  0xbd   : > { %v1131_v19 = vpop.eup %1130  ;;  %1134 = vrcp.f32 %v347_v16  ;;  %v403_v20 = vadd.f32 1.0, %v1129_v17  ;;  %v589_v59 = vstv %s1672_s20  ;;  %s1709_s20 = sld [smem:[#allocation2 + $0x50]] }
  0xbe   : > { %v1133_v21 = vpop.eup %1132  ;;  %1136 = vrcp.f32 %v375_v18  ;;  %v431_v22 = vadd.f32 1.0, %v1131_v19  ;;  %s1716_s13 = sld [smem:[#allocation2 + $0x5f]] }
  0xbf   : > { %1138 = vrcp.f32 %v403_v20  ;;  %v459_v23 = vadd.f32 1.0, %v1133_v21  ;;  %s1718_s14 = sld [smem:[#allocation2 + $0x65]] }
  0xc0   : > { %1140 = vrcp.f32 %v431_v22  ;;  %s1720_s15 = sld [smem:[#allocation2 + $0x4c]] }
  0xc1   : > { %1142 = vrcp.f32 %v459_v23  ;;  %s1722_s18 = sld [smem:[#allocation2 + $0x51]] }
  0xc2   : > { %s1724_s21 = sld [smem:[#allocation2 + $0x56]] }
  0xc3   : > { %s1726_s24 = sld [smem:[#allocation2 + $0x5b]] }
  0xc4   : > { %s1728_s4 = sld [smem:[#allocation2 + $0x60]] }
  0xc5   : > { %s1730_s9 = sld [smem:[#allocation2 + $0x66]] }
  0xc6   : > { %s1732_s11 = sld [smem:[#allocation2 + $0x4d]] }
  0xc7   : > { %s1734_s28 = sld [smem:[#allocation2 + $0x52]] }
  0xc8   : > { %s1736_s8 = sld [smem:[#allocation2 + $0x57]] }
  0xc9   : > { %s1738_s27 = sld [smem:[#allocation2 + $0x5c]] }
  0xca   : > { %v1135_v48 = vpop.eup %1134  ;;  %s1740_s26 = sld [smem:[#allocation2 + $0x61]] }
  0xcb   : > { %v1137_v53 = vpop.eup %1136  ;;  %v465_v54 = vmul.f32 %v1135_v48, %v464_v24  ;;  %v493_v57 = vmul.f32 %v1135_v48, %v492_v30  ;;  %v521_v58 = vmul.f32 %v1135_v48, %v520_v36  ;;  %v549_v2 = vmul.f32 %v1135_v48, %v548_v42  ;;  %s1742_s19 = sld [smem:[#allocation2 + $0x67]] }
  0xcc   : > { %v1139_v60 = vpop.eup %1138  ;;  %v470_v61 = vmul.f32 %v1137_v53, %v469_v26  ;;  %v498_v0 = vmul.f32 %v1137_v53, %v497_v32  ;;  %v526_v1 = vmul.f32 %v1137_v53, %v525_v38  ;;  %v554_v56 = vmul.f32 %v1137_v53, %v553_v44  ;;  %s1744_s22 = sld [smem:[#allocation2 + $0x4e]] }
  0xcd   : > { %v1141_v3 = vpop.eup %1140  ;;  %v467_v4 = vadd.f32 %v466_v25, %v465_v54  ;;  %v474_v55 = vmul.f32 %v1139_v60, %v473_v27  ;;  %v495_v62 = vadd.f32 %v494_v31, %v493_v57  ;;  %v502_v5 = vmul.f32 %v1139_v60, %v501_v33  ;;  %s1746_s17 = sld [smem:[#allocation2 + $0x53]] }
  0xce   : > { %v1143_v6 = vpop.eup %1142  ;;  %v478_v8 = vmul.f32 %v1141_v3, %v477_v28  ;;  %v523_v9 = vadd.f32 %v522_v37, %v521_v58  ;;  %v530_v10 = vmul.f32 %v1139_v60, %v529_v39  ;;  %v506_v12 = vmul.f32 %v1141_v3, %v505_v34  ;;  %s1748_s10 = sld [smem:[#allocation2 + $0x58]] }
  0xcf   : > { %v471_v11 = vadd.f32 %v470_v61, %v467_v4  ;;  %v482_v63 = vmul.f32 %v1143_v6, %v481_v29  ;;  %v499_v7 = vadd.f32 %v498_v0, %v495_v62  ;;  %v510_v13 = vmul.f32 %v1143_v6, %v509_v35  ;;  %s1750_s29 = sld [smem:[#allocation2 + $0x5d]] }
  0xd0   : > { %v527_v14 = vadd.f32 %v526_v1, %v523_v9  ;;  %v534_v15 = vmul.f32 %v1141_v3, %v533_v40  ;;  %v551_v16 = vadd.f32 %v550_v43, %v549_v2  ;;  %v538_v19 = vmul.f32 %v1143_v6, %v537_v41  ;;  %s1752_s25 = sld [smem:[#allocation2 + $0x62]] }
  0xd1   : > { %v475_v17 = vadd.f32 %v474_v55, %v471_v11  ;;  %v503_v18 = vadd.f32 %v502_v5, %v499_v7  ;;  %v558_v20 = vmul.f32 %v1139_v60, %v557_v45  ;;  %v562_v23 = vmul.f32 %v1141_v3, %v561_v46  ;;  %s1754_s5 = sld [smem:[#allocation2 + $0x68]] }
  0xd2   : > { %v531_v21 = vadd.f32 %v530_v10, %v527_v14  ;;  %v555_v22 = vadd.f32 %v554_v56, %v551_v16  ;;  %v577_v24 = vmul.f32 %v1135_v48, %v576_v49  ;;  %v566_v27 = vmul.f32 %v1143_v6, %v565_v47  ;;  %s1756_s6 = sld [smem:[#allocation2 + $0x4f]] }
  0xd3   : > { %v479_v25 = vadd.f32 %v478_v8, %v475_v17  ;;  %v507_v26 = vadd.f32 %v506_v12, %v503_v18  ;;  %v582_v28 = vmul.f32 %v1137_v53, %v581_v51  ;;  %v586_v32 = vmul.f32 %v1139_v60, %v585_v52  ;;  %s1758_s7 = sld [smem:[#allocation2 + $0x54]] }
  0xd4   : > { %v535_v29 = vadd.f32 %v534_v15, %v531_v21  ;;  %v559_v30 = vadd.f32 %v558_v20, %v555_v22  ;;  %v579_v31 = vadd.f32 %v578_v50, %v577_v24  ;;  %v593_v35 = vstv %s1703_s1  ;;  %s1760_s0 = sld [smem:[#allocation2 + $0x59]] }
  0xd5   : > { %v483_v33 = vadd.f32 %v482_v63, %v479_v25  ;;  %v511_v34 = vadd.f32 %v510_v13, %v507_v26  ;;  %v590_v39 = vmul.f32 %v1141_v3, %v589_v59  ;;  %v594_v45 = vmul.f32 %v1143_v6, %v593_v35  ;;  %s1762_s1 = sld [smem:[#allocation2 + $0x5e]] }
  0xd6   : > { %v539_v36 = vadd.f32 %v538_v19, %v535_v29  ;;  %v563_v37 = vadd.f32 %v562_v23, %v559_v30  ;;  %v583_v38 = vadd.f32 %v582_v28, %v579_v31  ;;  %v604_v0 = vstv %s1707_s23  ;;  %s1028_s23 = sld [smem:[#allocation2 + $0x6e]] }
  0xd7   : > { %v964_v40 = vmul.f32 -1.442695, %v483_v33  ;;  %v971_v41 = vmul.f32 -1.442695, %v511_v34  ;;  %v606_v1 = vstv %s1705_s3  ;;  %v609_v2 = vstv %s1709_s20  ;;  %s1793_s3 = sld [smem:[#allocation2 + $0x63]] }
  0xd8   : > { %v978_v42 = vmul.f32 -1.442695, %v539_v36  ;;  %v567_v43 = vadd.f32 %v566_v27, %v563_v37  ;;  %v587_v44 = vadd.f32 %v586_v32, %v583_v38  ;;  %v613_v3 = vstv %s1712_s2  ;;  %s1029_s20 = sld [smem:[#allocation2 + $0x69]] }
  0xd9   : > { %1144 = vpow2.f32 %v964_v40  ;;  %v617_v4 = vstv %s1714_s12  ;;  %v621_v55 = vstv %s1716_s13  ;;  %v632_v62 = vstv %s1720_s15  ;;  %s1030_s2 = sld [smem:[#allocation2 + $0x6a]] }
  0xda   : > { %1146 = vpow2.f32 %v971_v41  ;;  %v985_v46 = vmul.f32 -1.442695, %v567_v43  ;;  %v591_v47 = vadd.f32 %v590_v39, %v587_v44  ;;  %v634_v5 = vstv %s1718_s14  ;;  %s1031_s12 = sld [smem:[#allocation2 + $0x6b]] }
  0xdb   : > { %1148 = vpow2.f32 %v978_v42  ;;  %v637_v6 = vstv %s1722_s18  ;;  %v641_v8 = vstv %s1724_s21  ;;  %v645_v9 = vstv %s1726_s24  ;;  %s1032_s13 = sld [smem:[#allocation2 + $0x6c]]  ;;  %s1041_s21 = sshll.u32 %s1370_s16, 5 }
  0xdc   : > { %1150 = vpow2.f32 %v985_v46  ;;  %v595_v48 = vadd.f32 %v594_v45, %v591_v47  ;;  %v649_v10 = vstv %s1728_s4  ;;  %v660_v56 = vstv %s1732_s11  ;;  %s1033_s14 = sld [smem:[#allocation2 + $0x6d]]  ;;  %s236_s24 = scalar_lea.vmem [#allocation9], %s1500_s30 }
  0xdd   : > { %v662_v11 = vstv %s1730_s9  ;;  %v665_v63 = vstv %s1734_s28  ;;  %v669_v7 = vstv %s1736_s8  ;;  %v673_v12 = vstv %s1738_s27  ;;  %s1875_s15 = sld [smem:[#allocation22_spill]]  ;;  %s784_s4 = sshll.u32 %s236_s24, 4  ;;  %s785_s4 = int_to_ptr.vmem [resolvable:$true] %s784_s4 }
  0xde   : > { %v992_v49 = vmul.f32 -1.442695, %v595_v48  ;;  %v677_v13 = vstv %s1740_s26  ;;  %v688_v14 = vstv %s1744_s22  ;;  %v690_v15 = vstv %s1742_s19  ;;  %s1876_s18 = sld [smem:[#allocation20_spill]]  ;;  %s1251_s26 = scalar_lea.vmem %s785_s4, 32 }
  0xdf   : > { %v693_v16 = vstv %s1746_s17  ;;  %v697_v17 = vstv %s1748_s10  ;;  %v701_v18 = vstv %s1750_s29  ;;  %v705_v19 = vstv %s1752_s25  ;;  %s1877_s28 = sld [smem:[#allocation26_spill]]  ;;  %p1252_p11 = scmp.ne.s32.totalorder %s785_s4, %s1251_s26 }
  0xe0   : > { %1152 = vpow2.f32 %v992_v49  ;;  %v716_v20 = vstv %s1756_s6  ;;  %v718_v22 = vstv %s1754_s5  ;;  %v721_v23 = vstv %s1758_s7  ;;  %s1328_s19 = smov [#allocation9]  }
  0xe1   : > { %v725_v24 = vstv %s1760_s0  ;;  %v729_v25 = vstv %s1762_s1  ;;  %s1255_s22 = sshll.u32 %s1328_s19, 4  ;;  %s1256_s22 = int_to_ptr.vmem [resolvable:$false] %s1255_s22 }
  0xe2   : > { %s1257_s16 = scalar_lea.vmem %s1256_s22, 64  ;;  %p1258_p4 = scmp.lt.s32.totalorder %s785_s4, %s1256_s22 }
  0xe3   : > { %s770_s27 = scalar_lea.sflag [#allocation4], %s1875_s15  ;;  %p1259_p2 = scmp.lt.s32.totalorder %s1257_s16, %s1251_s26 }
  0xe4   : > { %p1878_p12 = scmp.ne.s32.totalorder %s1876_s18, 0 }
  0xe5   : > { %s782_s8 = scalar_lea.hbm %s1877_s28, %s1041_s21  ;;  %p1260_p7 = por %p1259_p2, %p1258_p4 }
  0xe6   : > { %v1145_v50 = vpop.eup %1144  ;;  %p1253_p13 = pnand %p1252_p11, %p1878_p12 }
  0xe7   : > { %v1147_v51 = vpop.eup %1146  ;;  %v487_v52 = vadd.f32 1.0, %v1145_v50 }
  0xe8   : > { %v1149_v53 = vpop.eup %1148  ;;  %v515_v54 = vadd.f32 1.0, %v1147_v51  ;;  %p1254_p1 = pneg %p1253_p13 }
  0xe9   : > { %v1151_v57 = vpop.eup %1150  ;;  %1154 = vrcp.f32 %v487_v52  ;;  %v543_v58 = vadd.f32 1.0, %v1149_v53 }
  0xea   : > { %1156 = vrcp.f32 %v515_v54  ;;  %v571_v59 = vadd.f32 1.0, %v1151_v57  ;;  %p1261_p9 = pnand %p1260_p7, %p1254_p1 }
  0xeb   : > { %1158 = vrcp.f32 %v543_v58 }
  0xec   : > { %1160 = vrcp.f32 %v571_v59 }
  0xed   : > { %v1153_v60 = vpop.eup %1152 }
  0xee   : > { %v599_v61 = vadd.f32 1.0, %v1153_v60 }
  0xf0   : > { %1162 = vrcp.f32 %v599_v61 }
  0xf6   : > { %v1155_v21 = vpop.eup %1154 }
  0xf7   : > { %v1157_v26 = vpop.eup %1156  ;;  %v605_v27 = vmul.f32 %v1155_v21, %v604_v0  ;;  %v633_v28 = vmul.f32 %v1155_v21, %v632_v62  ;;  %v661_v29 = vmul.f32 %v1155_v21, %v660_v56  ;;  %v689_v30 = vmul.f32 %v1155_v21, %v688_v14 }
  0xf8   : > { %v1159_v31 = vpop.eup %1158  ;;  %v610_v32 = vmul.f32 %v1157_v26, %v609_v2  ;;  %v638_v33 = vmul.f32 %v1157_v26, %v637_v6  ;;  %v666_v34 = vmul.f32 %v1157_v26, %v665_v63  ;;  %v694_v35 = vmul.f32 %v1157_v26, %v693_v16 }
  0xf9   : > { %v1161_v36 = vpop.eup %1160  ;;  %v607_v37 = vadd.f32 %v606_v1, %v605_v27  ;;  %v614_v38 = vmul.f32 %v1159_v31, %v613_v3  ;;  %v635_v39 = vadd.f32 %v634_v5, %v633_v28  ;;  %v642_v40 = vmul.f32 %v1159_v31, %v641_v8 }
  0xfa   : > { %v618_v41 = vmul.f32 %v1161_v36, %v617_v4  ;;  %v646_v42 = vmul.f32 %v1161_v36, %v645_v9  ;;  %v663_v43 = vadd.f32 %v662_v11, %v661_v29  ;;  %v670_v44 = vmul.f32 %v1159_v31, %v669_v7 }
  0xfb   : > { %v611_v45 = vadd.f32 %v610_v32, %v607_v37  ;;  %v639_v46 = vadd.f32 %v638_v33, %v635_v39  ;;  %v674_v47 = vmul.f32 %v1161_v36, %v673_v12  ;;  %v691_v48 = vadd.f32 %v690_v15, %v689_v30 }
  0xfc   : > { %v667_v49 = vadd.f32 %v666_v34, %v663_v43  ;;  %v698_v50 = vmul.f32 %v1159_v31, %v697_v17  ;;  %v702_v51 = vmul.f32 %v1161_v36, %v701_v18  ;;  %v717_v52 = vmul.f32 %v1155_v21, %v716_v20 }
  0xfd   : > { %v1163_v53 = vpop.eup %1162  ;;  %v615_v54 = vadd.f32 %v614_v38, %v611_v45  ;;  %v643_v57 = vadd.f32 %v642_v40, %v639_v46  ;;  %v695_v58 = vadd.f32 %v694_v35, %v691_v48  ;;  %v722_v59 = vmul.f32 %v1157_v26, %v721_v23 }
  0xfe   : > { %v622_v60 = vmul.f32 %v1163_v53, %v621_v55  ;;  %v650_v61 = vmul.f32 %v1163_v53, %v649_v10  ;;  %v671_v0 = vadd.f32 %v670_v44, %v667_v49  ;;  %v678_v1 = vmul.f32 %v1163_v53, %v677_v13 }
  0xff   : > { %v619_v2 = vadd.f32 %v618_v41, %v615_v54  ;;  %v647_v3 = vadd.f32 %v646_v42, %v643_v57  ;;  %v699_v4 = vadd.f32 %v698_v50, %v695_v58  ;;  %v706_v62 = vmul.f32 %v1163_v53, %v705_v19 }
 0x100   : > { %v675_v5 = vadd.f32 %v674_v47, %v671_v0  ;;  %v719_v6 = vadd.f32 %v718_v22, %v717_v52  ;;  %v726_v8 = vmul.f32 %v1159_v31, %v725_v24  ;;  %v733_v63 = vstv %s1793_s3 }
 0x101   : > { %v623_v9 = vadd.f32 %v622_v60, %v619_v2  ;;  %v651_v56 = vadd.f32 %v650_v61, %v647_v3  ;;  %v703_v11 = vadd.f32 %v702_v51, %v699_v4  ;;  %v730_v14 = vmul.f32 %v1161_v36, %v729_v25 }
 0x102   : > { %v679_v7 = vadd.f32 %v678_v1, %v675_v5  ;;  %v723_v12 = vadd.f32 %v722_v59, %v719_v6  ;;  %v734_v13 = vmul.f32 %v1163_v53, %v733_v63  ;;  %v744_v32 = vstv %s1029_s20 }
 0x103   : > { %v999_v15 = vmul.f32 -1.442695, %v623_v9  ;;  %v1006_v16 = vmul.f32 -1.442695, %v651_v56  ;;  %v707_v55 = vadd.f32 %v706_v62, %v703_v11  ;;  %v749_v33 = vstv %s1030_s2 }
 0x104   : > { %v1013_v10 = vmul.f32 -1.442695, %v679_v7  ;;  %v727_v17 = vadd.f32 %v726_v8, %v723_v12  ;;  %v746_v35 = vstv %s1028_s23  ;;  %v753_v36 = vstv %s1031_s12 }
 0x105   : > { %1164 = vpow2.f32 %v999_v15  ;;  %v1020_v18 = vmul.f32 -1.442695, %v707_v55  ;;  %v757_v41 = vstv %s1032_s13  ;;  %v761_v47 = vstv %s1033_s14 }
 0x106   : > { %1166 = vpow2.f32 %v1006_v16  ;;  %v731_v19 = vadd.f32 %v730_v14, %v727_v17  ;;  %v764_v48 = vlaneseq }
 0x107   : > { %1168 = vpow2.f32 %v1013_v10 }
 0x108   : > { %1170 = vpow2.f32 %v1020_v18  ;;  %v735_v20 = vadd.f32 %v734_v13, %v731_v19  ;;  %vm766_vm0 = vcmp.lt.s32.totalorder %v764_v48, 256 }
 0x10a   : > { %v1027_v21 = vmul.f32 -1.442695, %v735_v20 }
 0x10c   : > { %1172 = vpow2.f32 %v1027_v21 }
 0x112   : > { %v1165_v22 = vpop.eup %1164 }
 0x113   : > { %v1167_v23 = vpop.eup %1166  ;;  %v627_v24 = vadd.f32 1.0, %v1165_v22 }
 0x114   : > { %v1169_v26 = vpop.eup %1168  ;;  %v655_v25 = vadd.f32 1.0, %v1167_v23 }
 0x115   : > { %v1171_v27 = vpop.eup %1170  ;;  %1174 = vrcp.f32 %v627_v24  ;;  %v683_v28 = vadd.f32 1.0, %v1169_v26 }
 0x116   : > { %1176 = vrcp.f32 %v655_v25  ;;  %v711_v29 = vadd.f32 1.0, %v1171_v27 }
 0x117   : > { %1178 = vrcp.f32 %v683_v28 }
 0x118   : > { %1180 = vrcp.f32 %v711_v29 }
 0x119   : > { %v1173_v30 = vpop.eup %1172 }
 0x11a   : > { %v739_v31 = vadd.f32 1.0, %v1173_v30 }
 0x11c   : > { %1182 = vrcp.f32 %v739_v31 }
 0x122   : > { %v1175_v34 = vpop.eup %1174 }
 0x123   : > { %v1177_v37 = vpop.eup %1176  ;;  %v745_v38 = vmul.f32 %v1175_v34, %v744_v32 }
 0x124   : > { %v1179_v39 = vpop.eup %1178  ;;  %v750_v40 = vmul.f32 %v1177_v37, %v749_v33 }
 0x125   : > { %v1181_v42 = vpop.eup %1180  ;;  %v747_v43 = vadd.f32 %v746_v35, %v745_v38  ;;  %v754_v44 = vmul.f32 %v1179_v39, %v753_v36 }
 0x126   : > { %v758_v46 = vmul.f32 %v1181_v42, %v757_v41 }
 0x127   : > { %v751_v45 = vadd.f32 %v750_v40, %v747_v43 }
 0x129   : > { %v1183_v49 = vpop.eup %1182  ;;  %v755_v50 = vadd.f32 %v754_v44, %v751_v45 }
 0x12a   : > { %v762_v51 = vmul.f32 %v1183_v49, %v761_v47 }
 0x12b   : > { %v759_v52 = vadd.f32 %v758_v46, %v755_v50 }
 0x12d   : > { %v763_v53 = vadd.f32 %v762_v51, %v759_v52 }
 0x12f   : > { %768 = vst.msk [vmem:[%s236_s24] sm:$0x3] %vm766_vm0, %v763_v53 }
 0x130   : > { %1264 = shalt.err (!%p1261_p9)
}
 0x131   : > { %s1265_s30 = scalar_lea.hbm %s782_s8, 32  ;;  %s1269_s29 = scalar_lea.hbm %s1877_s28, 128 }
 0x132   : > { %p1266_p3 = scmp.ne.s32.totalorder %s782_s8, %s1265_s30  ;;  %p1270_p10 = scmp.lt.s32.totalorder %s782_s8, %s1877_s28 }
 0x133   : > { %p1271_p8 = scmp.lt.s32.totalorder %s1269_s29, %s1265_s30 }
 0x134   : > { %p1267_p5 = pnand %p1266_p3, %p1878_p12 }
 0x135   : > { %p1272_p0 = por %p1271_p8, %p1270_p10 }
 0x136   : > { %p1268_p6 = pneg %p1267_p5 }
 0x138   : > { %p1273_p11 = pnand %p1272_p0, %p1268_p6 }
 0x13a   : > { %1276 = shalt.err (!%p1273_p11)
}
 0x13b   : > { %1050 = dma.vmem_to_hbm [thread:$0]  (%p1878_p12), %s785_s4, 32, %s782_s8, %s770_s27  }
 0x13c PF: > { %s1879_s6 = sld [smem:[#allocation17_spill]] }
 0x13d   : > { %s1880_s7 = sld [smem:[#allocation14_spill]] }
 0x13e   : > { %s1881_s0 = sld [smem:[#allocation21_spill]] }
 0x142   : > { %p1070_p13 = scmp.ge.s32.totalorder %s1879_s6, 2 }
 0x143   : > { %s796_s1 = sand.u32 1, %s1880_s7  }
 0x144   : > { %p1882_p1 = scmp.ne.s32.totalorder %s1881_s0, 0  ;;  %s797_s3 = scalar_lea.sflag [#allocation4], %s796_s1 }
 0x146   : > { %p1064_p4 = pnand %p1070_p13, %p1882_p1 }
 0x148   : > { %p1065_p2 = pneg %p1064_p4 }
 0x14a   : > { %1306 = dma.done.wait (%p1065_p2), %s797_s3, 32  }
 0x14b   : > { %1308 = vsyncadd (%p1065_p2), %s797_s3, 4294967264  ;;  %s1883_s15 = sld [smem:[#allocation18_spill]] }
 0x14c   : > { %s1884_s12 = sld [smem:[#allocation15_spill]] }
 0x14d   : > { %s1885_s13 = sld [smem:[#allocation16_spill]] }
 0x14e   : > { %s1886_s14 = sld [smem:[#allocation19_spill]] }
 0x151   : > { %p20_p7 = scmp.ge.s32.totalorder %s1883_s15, 6  }
 0x153   :  { %22 = sbr.rel (!%p20_p7) target bundleno = 13 (0xd), region = 95 }
 0x158   :  { %802 = vsyncpa [#allocation3], 1 }
 0x159   :  { %804 = vsyncpa [#allocation3 + $0x1], 1 }
 0x15a   :  { %805 = vsyncpa [#allocation8], 1 }
 0x15b   :  { %807 = vsyncpa [#allocation8 + $0x1], 1 }
 0x15c   :  { %808 = vsyncpa [#allocation4], 1 }
 0x15d   :  { %810 = vsyncpa [#allocation4 + $0x1], 1 }
 0x15e   :  { %811 = vsyncpa [#allocation5], 1 }
 0x15f   :  { %813 = vsyncpa [#allocation5 + $0x1], 1 }

</bundles_post_ra>
